<compile_context>
chip_gen: v6e
topology: v6e:2x2x1
jax: 0.10.0
libtpu: 0.0.40
codegen_flags: <defaults>
</compile_context>

<pallas_src>
import functools
from math import sqrt

import jax
import jax.numpy as jnp
from jax import lax
from jax.experimental import pallas as pl
from jax.experimental.pallas import tpu as pltpu


# ----------------------------------------------------------------------------
# Kernel 1: diffusion conditioning
#   emb (B,128) -> Linear(128,512)+silu -> Linear(512,512)+silu
#   -> stacked per-layer diffusion_projection -> (B, n_layers*C)
# ----------------------------------------------------------------------------
def _conditioning_kernel(e_ref, w1_ref, b1_ref, w2_ref, b2_ref, wd_ref, bd_ref, d_ref):
    h = jnp.dot(e_ref[...], w1_ref[...], preferred_element_type=jnp.float32) + b1_ref[...]
    h = h * jax.nn.sigmoid(h)                             # silu
    h = jnp.dot(h, w2_ref[...], preferred_element_type=jnp.float32) + b2_ref[...]
    h = h * jax.nn.sigmoid(h)                             # silu
    d_ref[...] = (jnp.dot(h, wd_ref[...], preferred_element_type=jnp.float32)
                  + bd_ref[...]).astype(d_ref.dtype)


def diffusion_conditioning(emb, w1t, b1, w2t, b2, wd_t, bd):
    # emb: (B, 128); w1t: (128,512); w2t: (512,512); wd_t: (512, n_layers*C)
    B = emb.shape[0]
    NC = wd_t.shape[1]
    return pl.pallas_call(
        _conditioning_kernel,
        out_shape=jax.ShapeDtypeStruct((B, NC), jnp.float32),
        grid=(1,),
        in_specs=[
            pl.BlockSpec((B, 128), lambda i: (0, 0)),
            pl.BlockSpec((128, 512), lambda i: (0, 0)),
            pl.BlockSpec((1, 512), lambda i: (0, 0)),
            pl.BlockSpec((512, 512), lambda i: (0, 0)),
            pl.BlockSpec((1, 512), lambda i: (0, 0)),
            pl.BlockSpec((512, NC), lambda i: (0, 0)),
            pl.BlockSpec((1, NC), lambda i: (0, 0)),
        ],
        out_specs=pl.BlockSpec((B, NC), lambda i: (0, 0)),
    )(emb, w1t, b1.reshape(1, 512), w2t, b2.reshape(1, 512), wd_t, bd.reshape(1, NC))


# ----------------------------------------------------------------------------
# Kernel 2: fully fused residual stack (+ input projection + output head)
# grid = (batch, layer); layer axis is the resident/accumulating axis.
# ----------------------------------------------------------------------------
def _diffwave_stack_kernel(audio_ref, dstep_ref, spec_hbm_ref,
                           wf_ref, ow_ref, ob_ref,
                           inw_ref, inb_ref, skw_ref, skb_ref, fw_ref, fb_ref,
                           out_ref,
                           x_scr, skip_scr, rhs_scr, ypad_scr, spec_sem,
                           *, C, M, cycle, n_layers, pad):
    L = x_scr.shape[1]
    K3 = 3 * C
    b = pl.program_id(0)
    l = pl.program_id(1)

    @pl.when(l == 0)
    def _init():
        # Once-per-batch spectrogram DMA straight into the conditioner rows of
        # the fused-matmul RHS (layer-invariant; no pipelined (M,L) block).
        cp = pltpu.make_async_copy(spec_hbm_ref.at[b],
                                   rhs_scr.at[pl.ds(K3, M)],
                                   spec_sem)
        cp.start()
        # input_projection Conv1d(1, C, 1) + ReLU as a VPU broadcast mul-add
        x0 = inw_ref[...] * audio_ref[0] + inb_ref[...]          # (C,1)*(1,L)+(C,1)
        x_scr[...] = jnp.maximum(x0, 0.0)
        skip_scr[...] = jnp.zeros_like(skip_scr)
        # constant-one row multiplying the folded dilated+conditioner bias column
        rhs_scr[pl.ds(K3 + M, 1), :] = jnp.ones((1, L), jnp.bfloat16)
        # zero the halos of the padded-tap buffer (taps read zeros outside [0,L))
        ypad_scr[...] = jnp.zeros_like(ypad_scr)
        cp.wait()

    x = x_scr[...]                                               # (C, L) f32
    dcol = dstep_ref[0, l]                                       # (C, 1) diffusion projection
    y = (x + dcol).astype(jnp.bfloat16)                          # bf16 matmul operand

    # dilated-conv taps via zero-halo padded slices (no rolls / iota / selects)
    ypad_scr[:, pl.ds(pad, L)] = y
    rhs_scr[pl.ds(C, C), :] = y                                  # center tap
    didx = l % cycle                                             # dilation = 2 ** (l % cycle)
    for ci in range(cycle):
        d = 2 ** ci

        @pl.when(didx == ci)
        def _(d=d):
            rhs_scr[pl.ds(0, C), :] = ypad_scr[:, pl.ds(pad - d, L)]       # y[t - d]
            rhs_scr[pl.ds(2 * C, C), :] = ypad_scr[:, pl.ds(pad + d, L)]   # y[t + d]

    # dilated Conv1d(k=3, dilation=d, padding=d) + conditioner_projection + bias
    # as ONE wide-K bf16 MXU matmul with f32 accumulation:
    #   (2C, 3C + n_mels + 1) @ (3C + n_mels + 1, L)
    acc = jnp.dot(wf_ref[l], rhs_scr[...], preferred_element_type=jnp.float32)

    z = jax.nn.sigmoid(acc[:C]) * jnp.tanh(acc[C:])              # (C, L) f32 VPU/EUP

    out = (jnp.dot(ow_ref[l], z.astype(jnp.bfloat16),
                   preferred_element_type=jnp.float32) + ob_ref[l])        # (2C, L)

    # residual update stays resident in VMEM across the layer axis
    x_scr[...] = (x + out[:C]) * (1.0 / sqrt(2.0))
    skip_scr[...] = skip_scr[...] + out[C:]

    # tail: skip (1/sqrt(n) folded into skw) -> skip_projection -> ReLU -> output_projection
    @pl.when(l == n_layers - 1)
    def _tail():
        s = skip_scr[...].astype(jnp.bfloat16)
        h = jnp.dot(skw_ref[...], s, preferred_element_type=jnp.float32) + skb_ref[...]
        h = jnp.maximum(h, 0.0).astype(jnp.bfloat16)
        o = jnp.dot(fw_ref[...], h, preferred_element_type=jnp.float32) + fb_ref[...]
        out_ref[0] = o.astype(out_ref.dtype)


def diffwave_stack(audio_bcl, spec_bf16, dstep, pk, cfg):
    B, _, L = audio_bcl.shape
    C = cfg["residual_channels"]
    M = cfg["n_mel"]
    n_layers = cfg["residual_layers"]
    cycle = cfg["dilation_cycle_length"]
    K = 3 * C + M + 1                                     # taps + conditioner + ones row
    d_max = 2 ** (cycle - 1)
    pad = ((d_max + 127) // 128) * 128                    # lane-aligned halo

    kernel = functools.partial(_diffwave_stack_kernel, C=C, M=M, cycle=cycle,
                               n_layers=n_layers, pad=pad)
    return pl.pallas_call(
        kernel,
        out_shape=jax.ShapeDtypeStruct((B, 1, L), jnp.float32),
        grid=(B, n_layers),
        in_specs=[
            pl.BlockSpec((1, 1, L), lambda b, l: (b, 0, 0)),              # audio
            pl.BlockSpec((1, n_layers, C, 1), lambda b, l: (b, 0, 0, 0)), # per-batch diffusion proj
            pl.BlockSpec(memory_space=pl.ANY),                            # upsampled spec (HBM, bf16)
            pl.BlockSpec((n_layers, 2 * C, K), lambda b, l: (0, 0, 0)),   # fused dilated+cond+bias W (resident)
            pl.BlockSpec((n_layers, 2 * C, C), lambda b, l: (0, 0, 0)),   # output_projection W (resident)
            pl.BlockSpec((n_layers, 2 * C, 1), lambda b, l: (0, 0, 0)),   # output_projection b (resident)
            pl.BlockSpec((C, 1), lambda b, l: (0, 0)),                    # input_projection weight
            pl.BlockSpec((C, 1), lambda b, l: (0, 0)),                    # input_projection bias
            pl.BlockSpec((C, C), lambda b, l: (0, 0)),                    # skip_projection weight (scaled, bf16)
            pl.BlockSpec((C, 1), lambda b, l: (0, 0)),                    # skip_projection bias
            pl.BlockSpec((1, C), lambda b, l: (0, 0)),                    # final projection weight (bf16)
            pl.BlockSpec((1, 1), lambda b, l: (0, 0)),                    # final projection bias
        ],
        out_specs=pl.BlockSpec((1, 1, L), lambda b, l: (b, 0, 0)),
        scratch_shapes=[
            pltpu.VMEM((C, L), jnp.float32),                # residual state x
            pltpu.VMEM((C, L), jnp.float32),                # skip accumulator
            pltpu.VMEM((K, L), jnp.bfloat16),               # fused RHS [tap-,center,tap+,spec,ones]
            pltpu.VMEM((C, L + 2 * pad), jnp.bfloat16),     # zero-halo padded y (taps)
            pltpu.SemaphoreType.DMA,                        # spectrogram DMA semaphore
        ],
        compiler_params=pltpu.CompilerParams(
            dimension_semantics=("parallel", "arbitrary"),
            vmem_limit_bytes=48 * 1024 * 1024),
    )(audio_bcl, dstep, spec_bf16,
      pk["wf"], pk["ow"], pk["ob"],
      pk["in_w"], pk["in_b"], pk["skip_w"], pk["skip_b"], pk["final_w"], pk["final_b"])


# ----------------------------------------------------------------------------
# SpectrogramUpsampler (plain-JAX glue)
# TODO(synk): ConvTranspose2d upsampler + leaky_relu kept in plain JAX
#             (lax.conv_general_dilated with lhs_dilation), not a Pallas kernel.
# ----------------------------------------------------------------------------
def _conv_transpose_1ch(x, w, b, stride_w, pad_h, pad_w):
    # x: (B,1,H,W); w: PyTorch ConvTranspose2d weight (in=1, out=1, kh, kw)
    kh, kw = int(w.shape[2]), int(w.shape[3])
    w_flip = jnp.flip(w, axis=(2, 3))
    w_oihw = jnp.transpose(w_flip, (1, 0, 2, 3))          # (out, in, kh, kw)
    y = lax.conv_general_dilated(
        x, w_oihw,
        window_strides=(1, 1),
        padding=((kh - 1 - pad_h, kh - 1 - pad_h), (kw - 1 - pad_w, kw - 1 - pad_w)),
        lhs_dilation=(1, stride_w),
        dimension_numbers=("NCHW", "OIHW", "NCHW"))
    return y + b.reshape(1, -1, 1, 1)


def _leaky_relu(x, slope):
    return jnp.where(x >= 0, x, slope * x)


def spectrogram_upsample(spec, params, f1, f2):
    s = spec[:, None, :, :]                               # (B, 1, M, T)
    s = _leaky_relu(_conv_transpose_1ch(s, params["up1_w"], params["up1_b"], f1, 1, f1 // 2), 0.4)
    s = _leaky_relu(_conv_transpose_1ch(s, params["up2_w"], params["up2_b"], f2, 1, f2 // 2), 0.4)
    return s[:, 0]                                        # (B, M, T*f1*f2)


# ----------------------------------------------------------------------------
# Parameter packing (fuses / stacks the per-layer weights for the kernels)
# ----------------------------------------------------------------------------
def pack_params(params, cfg):
    C = cfg["residual_channels"]
    layers = params["layers"]
    n_layers = len(layers)
    bf16 = jnp.bfloat16
    # [tap- | center | tap+ | conditioner | fused bias] -> (n_layers, 2C, 3C+n_mels+1), bf16
    wf = jnp.stack([jnp.concatenate(
        [lp["dilated_w"][:, :, 0],
         lp["dilated_w"][:, :, 1],
         lp["dilated_w"][:, :, 2],
         lp["cond_w"],
         (lp["dilated_b"] + lp["cond_b"])[:, None]], axis=1) for lp in layers]).astype(bf16)
    ow = jnp.stack([lp["out_w"] for lp in layers]).astype(bf16)         # (n_layers, 2C, C)
    ob = jnp.stack([lp["out_b"].reshape(2 * C, 1) for lp in layers])    # f32
    diff_wt = jnp.stack([lp["diff_w"] for lp in layers]).reshape(n_layers * C, 512).T
    diff_b = jnp.stack([lp["diff_b"] for lp in layers]).reshape(n_layers * C)
    return {
        "wf": wf, "ow": ow, "ob": ob,
        "diff_wt": diff_wt, "diff_b": diff_b,
        "in_w": params["input_w"], "in_b": params["input_b"].reshape(C, 1),
        "skip_w": (params["skip_w"] / sqrt(float(n_layers))).astype(bf16),   # 1/sqrt(n) folded
        "skip_b": params["skip_b"].reshape(C, 1),
        "final_w": params["final_w"].astype(bf16),
        "final_b": params["final_b"].reshape(1, 1),
    }


# ----------------------------------------------------------------------------
# Full forward
# ----------------------------------------------------------------------------
def diffwave_forward(params, audio, diffusion_step, spectrogram, cfg):
    B, L = audio.shape
    C = cfg["residual_channels"]
    n_layers = cfg["residual_layers"]

    pk = pack_params(params, cfg)

    # diffusion embedding: integer-step table lookup (glue) + fused MLP/projection kernel
    emb = params["emb_table"][diffusion_step]                          # (B, 128)
    dstep = diffusion_conditioning(emb, params["proj1_wt"], params["proj1_b"],
                                   params["proj2_wt"], params["proj2_b"],
                                   pk["diff_wt"], pk["diff_b"])        # (B, n_layers*C)
    dstep = dstep.reshape(B, n_layers, C, 1)

    # spectrogram upsampler (glue); cast to bf16 so the kernel can DMA it
    # straight into the bf16 RHS scratch.
    f1, f2 = cfg["upsample_factors"]
    spec = spectrogram_upsample(spectrogram, params, f1, f2).astype(jnp.bfloat16)

    # fused: input projection + residual stack + skip/output projections
    audio_bcl = audio.reshape(B, 1, L)
    return diffwave_stack(audio_bcl, spec, dstep, pk, cfg)             # (B, 1, L)


# ----------------------------------------------------------------------------
# Pure-JAX reference (mirrors the PyTorch module, with the same bf16-matmul /
# f32-accumulate policy as the Pallas kernels so the comparison stays tight).
# ----------------------------------------------------------------------------
def _reference_forward(params, audio, diffusion_step, spectrogram, cfg):
    bf16 = jnp.bfloat16
    B, L = audio.shape
    C = cfg["residual_channels"]
    n_layers = cfg["residual_layers"]
    x = params["input_w"][None] * audio[:, None, :] + params["input_b"].reshape(1, C, 1)
    x = jnp.maximum(x, 0.0)
    emb = params["emb_table"][diffusion_step]
    h = emb @ params["proj1_wt"] + params["proj1_b"]
    h = h * jax.nn.sigmoid(h)
    h = h @ params["proj2_wt"] + params["proj2_b"]
    demb = h * jax.nn.sigmoid(h)
    f1, f2 = cfg["upsample_factors"]
    spec = spectrogram_upsample(spectrogram, params, f1, f2).astype(bf16)
    skip = None
    for i, lp in enumerate(params["layers"]):
        d = 2 ** (i % cfg["dilation_cycle_length"])
        dstep = (demb @ lp["diff_w"].T + lp["diff_b"])[:, :, None]
        y = (x + dstep).astype(bf16)
        yp = jnp.pad(y, ((0, 0), (0, 0), (d, d)))
        w = lp["dilated_w"].astype(bf16)
        conv = (jnp.einsum("oc,bcl->bol", w[:, :, 0], yp[:, :, 0:L],
                           preferred_element_type=jnp.float32)
                + jnp.einsum("oc,bcl->bol", w[:, :, 1], yp[:, :, d:d + L],
                             preferred_element_type=jnp.float32)
                + jnp.einsum("oc,bcl->bol", w[:, :, 2], yp[:, :, 2 * d:2 * d + L],
                             preferred_element_type=jnp.float32))
        cond = jnp.einsum("om,bml->bol", lp["cond_w"].astype(bf16), spec,
                          preferred_element_type=jnp.float32)
        bias = (lp["dilated_b"] + lp["cond_b"]).astype(bf16).astype(jnp.float32)
        yy = conv + cond + bias[None, :, None]
        z = jax.nn.sigmoid(yy[:, :C]) * jnp.tanh(yy[:, C:])
        out = jnp.einsum("oc,bcl->bol", lp["out_w"].astype(bf16), z.astype(bf16),
                         preferred_element_type=jnp.float32) + lp["out_b"][None, :, None]
        x = (x + out[:, :C]) / sqrt(2.0)
        skip = out[:, C:] if skip is None else skip + out[:, C:]
    skw = (params["skip_w"] / sqrt(float(n_layers))).astype(bf16)
    xx = jnp.einsum("oc,bcl->bol", skw, skip.astype(bf16),
                    preferred_element_type=jnp.float32) + params["skip_b"][None, :, None]
    xx = jnp.maximum(xx, 0.0)
    xx = jnp.einsum("oc,bcl->bol", params["final_w"].astype(bf16), xx.astype(bf16),
                    preferred_element_type=jnp.float32) + params["final_b"][None, :, None]
    return xx


# ----------------------------------------------------------------------------
# Deterministic parameter init (shapes follow the PyTorch __init__)
# ----------------------------------------------------------------------------
def init_params(key, cfg, max_steps):
    C = cfg["residual_channels"]
    M = cfg["n_mel"]
    f1, f2 = cfg["upsample_factors"]
    n_layers = cfg["residual_layers"]
    keys = iter(jax.random.split(key, 16 + 8 * n_layers))

    def nrm(shape, scale=0.1):
        return scale * jax.random.normal(next(keys), shape, dtype=jnp.float32)

    params = {}
    # input_projection: Conv1d(1, C, 1) -> weight squeezed to (C, 1)
    params["input_w"] = nrm((C, 1))
    params["input_b"] = nrm((C,))

    # DiffusionEmbedding buffer + Linears (weights pre-transposed for in-kernel matmul)
    steps = jnp.arange(max_steps, dtype=jnp.float32)[:, None]
    dims = jnp.arange(64, dtype=jnp.float32)[None, :]
    table = steps * 10.0 ** (dims * 4.0 / 63.0)
    params["emb_table"] = jnp.concatenate([jnp.sin(table), jnp.cos(table)], axis=1)
    params["proj1_wt"] = nrm((128, 512))
    params["proj1_b"] = nrm((512,))
    params["proj2_wt"] = nrm((512, 512))
    params["proj2_b"] = nrm((512,))

    # SpectrogramUpsampler ConvTranspose2d weights: (in=1, out=1, 3, 2*f)
    params["up1_w"] = nrm((1, 1, 3, 2 * f1))
    params["up1_b"] = nrm((1,))
    params["up2_w"] = nrm((1, 1, 3, 2 * f2))
    params["up2_b"] = nrm((1,))

    layers = []
    for _ in range(n_layers):
        layers.append({
            "dilated_w": nrm((2 * C, C, 3)),     # Conv1d(C, 2C, 3, dilation=d)
            "dilated_b": nrm((2 * C,)),
            "diff_w": nrm((C, 512)),             # Linear(512, C)
            "diff_b": nrm((C,)),
            "cond_w": nrm((2 * C, M)),           # Conv1d(n_mels, 2C, 1)
            "cond_b": nrm((2 * C,)),
            "out_w": nrm((2 * C, C)),            # Conv1d(C, 2C, 1)
            "out_b": nrm((2 * C,)),
        })
    params["layers"] = layers

    # skip_projection: Conv1d(C, C, 1); output_projection: Conv1d(C, 1, 1) zero-init weight
    params["skip_w"] = nrm((C, C))
    params["skip_b"] = nrm((C,))
    params["final_w"] = jnp.zeros((1, C), jnp.float32)    # nn.init.zeros_(output_projection.weight)
    params["final_b"] = nrm((1,))
    return params


if __name__ == "__main__":
    cfg = dict(
        n_mel=8,
        residual_channels=16,
        residual_layers=4,
        dilation_cycle_length=2,
        upsample_factors=(4, 4),
    )
    max_steps = 50
    B, T_mel = 2, 8
    L = T_mel * cfg["upsample_factors"][0] * cfg["upsample_factors"][1]   # 128

    key = jax.random.PRNGKey(0)
    k_audio, k_spec, k_params = jax.random.split(key, 3)
    audio = jax.random.normal(k_audio, (B, L), dtype=jnp.float32)
    spectrogram = jax.random.normal(k_spec, (B, cfg["n_mel"], T_mel), dtype=jnp.float32)
    diffusion_step = jnp.array([3, 17], dtype=jnp.int32)

    params = init_params(k_params, cfg, max_steps)

    # End-to-end numerical check of the fused kernels against a pure-JAX reference
    # that mirrors the bf16-matmul / f32-accumulate policy.
    # (test harness only: use a non-zero final projection weight so the check
    #  exercises the whole residual stack, not just the zero-initialized head)
    chk_params = dict(params)
    chk_params["final_w"] = 0.1 * jax.random.normal(
        jax.random.PRNGKey(42), (1, cfg["residual_channels"]), dtype=jnp.float32)
    ref = _reference_forward(chk_params, audio, diffusion_step, spectrogram, cfg)
    got = jax.block_until_ready(diffwave_forward(chk_params, audio, diffusion_step, spectrogram, cfg))
    max_err = float(jnp.max(jnp.abs(ref - got)))
    assert jnp.allclose(ref, got, rtol=5e-3, atol=5e-3), f"max abs err {max_err}"

    # Official forward with the module's true (zero-init output weight) params.
    out = diffwave_forward(params, audio, diffusion_step, spectrogram, cfg)
    out = jax.block_until_ready(out)

    assert out.shape == (B, 1, L), out.shape
    assert bool(jnp.all(jnp.isfinite(out)))
    print("KERNEL_OK")
</pallas_src>

<mosaic_0001>
module attributes {stable_mosaic.version = 11 : i64} {
  func.func @_conditioning_kernel(%arg0: i32, %arg1: memref<2x128xf32, #tpu.memory_space<vmem>>, %arg2: memref<128x512xf32, #tpu.memory_space<vmem>>, %arg3: memref<1x512xf32, #tpu.memory_space<vmem>>, %arg4: memref<512x512xf32, #tpu.memory_space<vmem>>, %arg5: memref<1x512xf32, #tpu.memory_space<vmem>>, %arg6: memref<512x64xf32, #tpu.memory_space<vmem>>, %arg7: memref<1x64xf32, #tpu.memory_space<vmem>>, %arg8: memref<2x64xf32, #tpu.memory_space<vmem>>) attributes {dimension_semantics = [#tpu.dimension_semantics<arbitrary>], iteration_bounds = array<i64: 1>, scalar_prefetch = 0 : i64, scratch_operands = 0 : i64, tpu.core_type = #tpu.core_type<tc>, window_params = [{pipeline_mode = #tpu.pipeline_mode<synchronous>, transform_indices = @transform_0, window_bounds = array<i64: 2, 128>}, {pipeline_mode = #tpu.pipeline_mode<synchronous>, transform_indices = @transform_1, window_bounds = array<i64: 128, 512>}, {pipeline_mode = #tpu.pipeline_mode<synchronous>, transform_indices = @transform_2, window_bounds = array<i64: 1, 512>}, {pipeline_mode = #tpu.pipeline_mode<synchronous>, transform_indices = @transform_3, window_bounds = array<i64: 512, 512>}, {pipeline_mode = #tpu.pipeline_mode<synchronous>, transform_indices = @transform_4, window_bounds = array<i64: 1, 512>}, {pipeline_mode = #tpu.pipeline_mode<synchronous>, transform_indices = @transform_5, window_bounds = array<i64: 512, 64>}, {pipeline_mode = #tpu.pipeline_mode<synchronous>, transform_indices = @transform_6, window_bounds = array<i64: 1, 64>}, {pipeline_mode = #tpu.pipeline_mode<synchronous>, transform_indices = @transform_7, window_bounds = array<i64: 2, 64>}]} {
    %c0 = arith.constant 0 : index
    %c0_0 = arith.constant 0 : index
    %0 = vector.load %arg1[%c0, %c0_0] : memref<2x128xf32, #tpu.memory_space<vmem>>, vector<2x128xf32>
    %c0_1 = arith.constant 0 : index
    %c0_2 = arith.constant 0 : index
    %1 = vector.load %arg2[%c0_1, %c0_2] : memref<128x512xf32, #tpu.memory_space<vmem>>, vector<128x512xf32>
    %cst = arith.constant dense<0.000000e+00> : vector<2x512xf32>
    %2 = tpu.matmul %0, %1, %cst {dimension_numbers = #tpu.dot_dimension_numbers<[1], [0], [0], [1], [0, 0, 1, 1], [], []>} : vector<2x128xf32>, vector<128x512xf32>, vector<2x512xf32> -> vector<2x512xf32>
    %c0_3 = arith.constant 0 : index
    %c0_4 = arith.constant 0 : index
    %3 = vector.load %arg3[%c0_3, %c0_4] : memref<1x512xf32, #tpu.memory_space<vmem>>, vector<1x512xf32>
    %4 = vector.broadcast %3 : vector<1x512xf32> to vector<2x512xf32>
    %5 = arith.addf %2, %4 : vector<2x512xf32>
    %6 = arith.negf %5 : vector<2x512xf32>
    %7 = math.exp %6 : vector<2x512xf32>
    %cst_5 = arith.constant 1.000000e+00 : f32
    %8 = vector.broadcast %cst_5 : f32 to vector<2x512xf32>
    %9 = arith.addf %8, %7 : vector<2x512xf32>
    %10 = arith.divf %8, %9 : vector<2x512xf32>
    %11 = arith.mulf %5, %10 : vector<2x512xf32>
    %c0_6 = arith.constant 0 : index
    %c0_7 = arith.constant 0 : index
    %12 = vector.load %arg4[%c0_6, %c0_7] : memref<512x512xf32, #tpu.memory_space<vmem>>, vector<512x512xf32>
    %cst_8 = arith.constant dense<0.000000e+00> : vector<2x512xf32>
    %13 = tpu.matmul %11, %12, %cst_8 {dimension_numbers = #tpu.dot_dimension_numbers<[1], [0], [0], [1], [0, 0, 1, 1], [], []>} : vector<2x512xf32>, vector<512x512xf32>, vector<2x512xf32> -> vector<2x512xf32>
    %c0_9 = arith.constant 0 : index
    %c0_10 = arith.constant 0 : index
    %14 = vector.load %arg5[%c0_9, %c0_10] : memref<1x512xf32, #tpu.memory_space<vmem>>, vector<1x512xf32>
    %15 = vector.broadcast %14 : vector<1x512xf32> to vector<2x512xf32>
    %16 = arith.addf %13, %15 : vector<2x512xf32>
    %17 = arith.negf %16 : vector<2x512xf32>
    %18 = math.exp %17 : vector<2x512xf32>
    %cst_11 = arith.constant 1.000000e+00 : f32
    %19 = vector.broadcast %cst_11 : f32 to vector<2x512xf32>
    %20 = arith.addf %19, %18 : vector<2x512xf32>
    %21 = arith.divf %19, %20 : vector<2x512xf32>
    %22 = arith.mulf %16, %21 : vector<2x512xf32>
    %c0_12 = arith.constant 0 : index
    %c0_13 = arith.constant 0 : index
    %23 = vector.load %arg6[%c0_12, %c0_13] : memref<512x64xf32, #tpu.memory_space<vmem>>, vector<512x64xf32>
    %cst_14 = arith.constant dense<0.000000e+00> : vector<2x64xf32>
    %24 = tpu.matmul %22, %23, %cst_14 {dimension_numbers = #tpu.dot_dimension_numbers<[1], [0], [0], [1], [0, 0, 1, 1], [], []>} : vector<2x512xf32>, vector<512x64xf32>, vector<2x64xf32> -> vector<2x64xf32>
    %c0_15 = arith.constant 0 : index
    %c0_16 = arith.constant 0 : index
    %25 = vector.load %arg7[%c0_15, %c0_16] : memref<1x64xf32, #tpu.memory_space<vmem>>, vector<1x64xf32>
    %26 = vector.broadcast %25 : vector<1x64xf32> to vector<2x64xf32>
    %27 = arith.addf %24, %26 : vector<2x64xf32>
    %c0_17 = arith.constant 0 : index
    %c0_18 = arith.constant 0 : index
    %28 = vector.load %arg8[%c0_17, %c0_18] : memref<2x64xf32, #tpu.memory_space<vmem>>, vector<2x64xf32>
    tpu.vector_store %arg8[%c0_17, %c0_18], %27 {strides = array<i32>} : memref<2x64xf32, #tpu.memory_space<vmem>>, vector<2x64xf32>,
    return
  }
  func.func @transform_0(%arg0: i32) -> (i32, i32) {
    %c0_i32 = arith.constant 0 : i32
    %c0_i32_0 = arith.constant 0 : i32
    %c0_i32_1 = arith.constant 0 : i32
    return %c0_i32, %c0_i32_0 : i32, i32
  }
  func.func @transform_1(%arg0: i32) -> (i32, i32) {
    %c0_i32 = arith.constant 0 : i32
    %c0_i32_0 = arith.constant 0 : i32
    %c0_i32_1 = arith.constant 0 : i32
    return %c0_i32, %c0_i32_0 : i32, i32
  }
  func.func @transform_2(%arg0: i32) -> (i32, i32) {
    %c0_i32 = arith.constant 0 : i32
    %c0_i32_0 = arith.constant 0 : i32
    %c0_i32_1 = arith.constant 0 : i32
    return %c0_i32, %c0_i32_0 : i32, i32
  }
  func.func @transform_3(%arg0: i32) -> (i32, i32) {
    %c0_i32 = arith.constant 0 : i32
    %c0_i32_0 = arith.constant 0 : i32
    %c0_i32_1 = arith.constant 0 : i32
    return %c0_i32, %c0_i32_0 : i32, i32
  }
  func.func @transform_4(%arg0: i32) -> (i32, i32) {
    %c0_i32 = arith.constant 0 : i32
    %c0_i32_0 = arith.constant 0 : i32
    %c0_i32_1 = arith.constant 0 : i32
    return %c0_i32, %c0_i32_0 : i32, i32
  }
  func.func @transform_5(%arg0: i32) -> (i32, i32) {
    %c0_i32 = arith.constant 0 : i32
    %c0_i32_0 = arith.constant 0 : i32
    %c0_i32_1 = arith.constant 0 : i32
    return %c0_i32, %c0_i32_0 : i32, i32
  }
  func.func @transform_6(%arg0: i32) -> (i32, i32) {
    %c0_i32 = arith.constant 0 : i32
    %c0_i32_0 = arith.constant 0 : i32
    %c0_i32_1 = arith.constant 0 : i32
    return %c0_i32, %c0_i32_0 : i32, i32
  }
  func.func @transform_7(%arg0: i32) -> (i32, i32) {
    %c0_i32 = arith.constant 0 : i32
    %c0_i32_0 = arith.constant 0 : i32
    %c0_i32_1 = arith.constant 0 : i32
    return %c0_i32, %c0_i32_0 : i32, i32
  }
}

</mosaic_0001>

<bundles_post_ra>
// kernel: tpu_custom_call.1
= control target key start
LH: loop header
LB: loop body
LE: loop exit
PB: predicated region body
PF: predicated region fallthrough
CT: control target
= control target key end

     0   :  { %12 = vsyncpa [#allocation3], 0  ;;  %s1753_s0 = inlined_call_operand.vmem [shape: f32[2,128], index: 0, kind: input, shape index: {}]   ;;  %s1754_s1 = inlined_call_operand.vmem [shape: f32[128,512], index: 1, kind: input, shape index: {}]   ;;  %s1755_s2 = inlined_call_operand.vmem [shape: f32[1,512], index: 2, kind: input, shape index: {}]   ;;  %s1756_s3 = inlined_call_operand.hbm [shape: f32[512,512], index: 3, kind: input, shape index: {}]   ;;  %s1757_s4 = inlined_call_operand.vmem [shape: f32[1,512], index: 4, kind: input, shape index: {}]   ;;  %s1758_s5 = inlined_call_operand.vmem [shape: f32[512,64], index: 5, kind: input, shape index: {}]   ;;  %s1759_s6 = inlined_call_operand.vmem [shape: f32[1,64], index: 6, kind: input, shape index: {}]   ;;  %s1760_s7 = inlined_call_operand.hbm [shape: f32[2,64], index: 7, kind: output, shape index: {}]  }
   0x1   :  { %13 = vsyncpa [#allocation4], 0  ;;  %s1276_s24 = smov [#allocation2]  }
   0x2   :  { %s25_s25 = sshll.u32 %s1276_s24, 4  ;;  %s26_s25 = int_to_ptr.vmem [resolvable:$true] %s25_s25 }
   0x3   :  { %s1240_s26 = scalar_lea.vmem %s26_s25, 32768  ;;  %p1245_p1 = scmp.lt.s32.totalorder %s26_s25, %s26_s25 }
   0x4   :  { %p1241_p0 = scmp.ne.s32.totalorder %s26_s25, %s1240_s26  ;;  %p1246_p2 = scmp.lt.s32.totalorder %s1240_s26, %s1240_s26 }
   0x6   :  { %p1247_p3 = por %p1246_p2, %p1245_p1 }
   0x8   :  { %p1248_p4 = pnand %p1247_p3, %p1241_p0 }
   0xa   :  { %1251 = shalt.err (!%p1248_p4)
}
   0xb   :  { %s1277_s27 = smov 512   ;;  %s1278_s28 = smov 32  }
   0xc   :  { %31 = dma.hbm_to_vmem [thread:$0]  %s1756_s3, 32768, %s26_s25, [#allocation3], %s1277_s27, %s1277_s27, %s1278_s28  }
   0xd   :  { %1272 = dma.done.wait [#allocation3], 32768  }
   0xe   :  { %1273 = vsyncadd [#allocation3], 4294934528  ;;  %v1279_v0 = vmov 0.0   ;;  %v103_v1 = vld [vmem:[%s1754_s1 + $0x1e8] sm:$0xff]  ;;  %v105_v2 = vld [vmem:[%s1754_s1 + $0x1f8] sm:$0xff]  ;;  %s1280_s14 = smov [#allocation5]  }
   0xf   :  { %192 = vmatprep.mubr.f32.mxu0 %v1279_v0  ;;  %263 = vmatprep.mubr.f32.mxu1 %v1279_v0  ;;  %v102_v3 = vld [vmem:[%s1754_s1 + $0x1e0] sm:$0xff]  ;;  %v104_v4 = vld [vmem:[%s1754_s1 + $0x1f0] sm:$0xff]  ;;  %v99_v5 = vld [vmem:[%s1754_s1 + $0x1c8] sm:$0xff]  ;;  %s1107_s15 = sshll.u32 %s1280_s14, 4  ;;  %vm1099_vm0 = vcmask 517120   ;;  %s1108_s15 = int_to_ptr.vmem [resolvable:$true] %s1107_s15 }
  0x10   :  { %128 = vmatprep.subr.mxu0 %v103_v1  ;;  %199 = vmatprep.subr.mxu1 %v105_v2  ;;  %v101_v6 = vld [vmem:[%s1754_s1 + $0x1d8] sm:$0xff]  ;;  %v98_v7 = vld [vmem:[%s1754_s1 + $0x1c0] sm:$0xff]  ;;  %v100_v8 = vld [vmem:[%s1754_s1 + $0x1d0] sm:$0xff]  ;;  %s1252_s16 = scalar_lea.vmem %s1108_s15, 32  ;;  %p1257_p6 = scmp.lt.s32.totalorder %s1108_s15, %s1108_s15 }
  0x11   :  { %129 = vmatpush1.msra.mxu0 %v102_v3  ;;  %200 = vmatpush1.msra.mxu1 %v104_v4  ;;  %v95_v9 = vld [vmem:[%s1754_s1 + $0x1a8] sm:$0xff]  ;;  %v97_v10 = vld [vmem:[%s1754_s1 + $0x1b8] sm:$0xff]  ;;  %v94_v11 = vld [vmem:[%s1754_s1 + $0x1a0] sm:$0xff]  ;;  %p1253_p5 = scmp.ne.s32.totalorder %s1108_s15, %s1252_s16  ;;  %p1258_p7 = scmp.lt.s32.totalorder %s1252_s16, %s1252_s16 }
  0x12   :  { %130 = vmatprep.subr.mxu0 %v99_v5  ;;  %201 = vmatprep.subr.mxu1 %v101_v6  ;;  %v96_v12 = vld [vmem:[%s1754_s1 + $0x1b0] sm:$0xff]  ;;  %v91_v13 = vld [vmem:[%s1754_s1 + $0x188] sm:$0xff]  ;;  %v93_v14 = vld [vmem:[%s1754_s1 + $0x198] sm:$0xff] }
  0x13   :  { %131 = vmatpush1.msra.mxu0 %v98_v7  ;;  %202 = vmatpush1.msra.mxu1 %v100_v8  ;;  %v90_v15 = vld [vmem:[%s1754_s1 + $0x180] sm:$0xff]  ;;  %v92_v16 = vld [vmem:[%s1754_s1 + $0x190] sm:$0xff]  ;;  %v87_v17 = vld [vmem:[%s1754_s1 + $0x168] sm:$0xff]  ;;  %p1259_p8 = por %p1258_p7, %p1257_p6 }
  0x14   :  { %132 = vmatprep.subr.mxu0 %v95_v9  ;;  %203 = vmatprep.subr.mxu1 %v97_v10  ;;  %v89_v18 = vld [vmem:[%s1754_s1 + $0x178] sm:$0xff]  ;;  %v86_v19 = vld [vmem:[%s1754_s1 + $0x160] sm:$0xff]  ;;  %v88_v20 = vld [vmem:[%s1754_s1 + $0x170] sm:$0xff] }
  0x15   :  { %133 = vmatpush1.msra.mxu0 %v94_v11  ;;  %204 = vmatpush1.msra.mxu1 %v96_v12  ;;  %v83_v21 = vld [vmem:[%s1754_s1 + $0x148] sm:$0xff]  ;;  %v85_v22 = vld [vmem:[%s1754_s1 + $0x158] sm:$0xff]  ;;  %v82_v23 = vld [vmem:[%s1754_s1 + $0x140] sm:$0xff]  ;;  %p1260_p9 = pnand %p1259_p8, %p1253_p5 }
  0x16   :  { %134 = vmatprep.subr.mxu0 %v91_v13  ;;  %205 = vmatprep.subr.mxu1 %v93_v14  ;;  %v84_v24 = vld [vmem:[%s1754_s1 + $0x150] sm:$0xff]  ;;  %v79_v25 = vld [vmem:[%s1754_s1 + $0x128] sm:$0xff]  ;;  %v81_v26 = vld [vmem:[%s1754_s1 + $0x138] sm:$0xff] }
  0x17   :  { %135 = vmatpush1.msra.mxu0 %v90_v15  ;;  %206 = vmatpush1.msra.mxu1 %v92_v16  ;;  %v78_v27 = vld [vmem:[%s1754_s1 + $0x120] sm:$0xff]  ;;  %v80_v28 = vld [vmem:[%s1754_s1 + $0x130] sm:$0xff]  ;;  %v75_v29 = vld [vmem:[%s1754_s1 + $0x108] sm:$0xff] }
  0x18   :  { %136 = vmatprep.subr.mxu0 %v87_v17  ;;  %207 = vmatprep.subr.mxu1 %v89_v18  ;;  %v77_v30 = vld [vmem:[%s1754_s1 + $0x118] sm:$0xff]  ;;  %v74_v31 = vld [vmem:[%s1754_s1 + $0x100] sm:$0xff]  ;;  %v76_v32 = vld [vmem:[%s1754_s1 + $0x110] sm:$0xff] }
  0x19   :  { %137 = vmatpush1.msra.mxu0 %v86_v19  ;;  %208 = vmatpush1.msra.mxu1 %v88_v20  ;;  %v71_v33 = vld [vmem:[%s1754_s1 + $0xe8] sm:$0xff]  ;;  %v73_v34 = vld [vmem:[%s1754_s1 + $0xf8] sm:$0xff]  ;;  %v70_v35 = vld [vmem:[%s1754_s1 + $0xe0] sm:$0xff] }
  0x1a   :  { %138 = vmatprep.subr.mxu0 %v83_v21  ;;  %209 = vmatprep.subr.mxu1 %v85_v22  ;;  %v72_v36 = vld [vmem:[%s1754_s1 + $0xf0] sm:$0xff]  ;;  %v67_v37 = vld [vmem:[%s1754_s1 + $0xc8] sm:$0xff]  ;;  %v69_v38 = vld [vmem:[%s1754_s1 + $0xd8] sm:$0xff] }
  0x1b   :  { %139 = vmatpush1.msra.mxu0 %v82_v23  ;;  %210 = vmatpush1.msra.mxu1 %v84_v24  ;;  %v66_v39 = vld [vmem:[%s1754_s1 + $0xc0] sm:$0xff]  ;;  %v68_v40 = vld [vmem:[%s1754_s1 + $0xd0] sm:$0xff]  ;;  %v63_v41 = vld [vmem:[%s1754_s1 + $0xa8] sm:$0xff] }
  0x1c   :  { %140 = vmatprep.subr.mxu0 %v79_v25  ;;  %211 = vmatprep.subr.mxu1 %v81_v26  ;;  %v65_v42 = vld [vmem:[%s1754_s1 + $0xb8] sm:$0xff]  ;;  %v62_v43 = vld [vmem:[%s1754_s1 + $0xa0] sm:$0xff]  ;;  %v64_v44 = vld [vmem:[%s1754_s1 + $0xb0] sm:$0xff] }
  0x1d   :  { %141 = vmatpush1.msra.mxu0 %v78_v27  ;;  %212 = vmatpush1.msra.mxu1 %v80_v28  ;;  %v59_v45 = vld [vmem:[%s1754_s1 + $0x88] sm:$0xff]  ;;  %v61_v46 = vld [vmem:[%s1754_s1 + $0x98] sm:$0xff]  ;;  %v58_v47 = vld [vmem:[%s1754_s1 + $0x80] sm:$0xff] }
  0x1e   :  { %142 = vmatprep.subr.mxu0 %v75_v29  ;;  %213 = vmatprep.subr.mxu1 %v77_v30  ;;  %v60_v48 = vld [vmem:[%s1754_s1 + $0x90] sm:$0xff]  ;;  %v55_v49 = vld [vmem:[%s1754_s1 + $0x68] sm:$0xff]  ;;  %v57_v50 = vld [vmem:[%s1754_s1 + $0x78] sm:$0xff] }
  0x1f   :  { %143 = vmatpush1.msra.mxu0 %v74_v31  ;;  %214 = vmatpush1.msra.mxu1 %v76_v32  ;;  %v54_v51 = vld [vmem:[%s1754_s1 + $0x60] sm:$0xff]  ;;  %v56_v52 = vld [vmem:[%s1754_s1 + $0x70] sm:$0xff]  ;;  %v51_v53 = vld [vmem:[%s1754_s1 + $0x48] sm:$0xff] }
  0x20   :  { %144 = vmatprep.subr.mxu0 %v71_v33  ;;  %215 = vmatprep.subr.mxu1 %v73_v34  ;;  %v53_v54 = vld [vmem:[%s1754_s1 + $0x58] sm:$0xff]  ;;  %v50_v55 = vld [vmem:[%s1754_s1 + $0x40] sm:$0xff]  ;;  %v52_v56 = vld [vmem:[%s1754_s1 + $0x50] sm:$0xff] }
  0x21   :  { %145 = vmatpush1.msra.mxu0 %v70_v35  ;;  %216 = vmatpush1.msra.mxu1 %v72_v36  ;;  %v47_v57 = vld [vmem:[%s1754_s1 + $0x28] sm:$0xff]  ;;  %v49_v58 = vld [vmem:[%s1754_s1 + $0x38] sm:$0xff]  ;;  %v46_v59 = vld [vmem:[%s1754_s1 + $0x20] sm:$0xff] }
  0x22   :  { %146 = vmatprep.subr.mxu0 %v67_v37  ;;  %217 = vmatprep.subr.mxu1 %v69_v38  ;;  %v48_v60 = vld [vmem:[%s1754_s1 + $0x30] sm:$0xff]  ;;  %v43_v61 = vld [vmem:[%s1754_s1 + $0x8] sm:$0xff]  ;;  %v45_v62 = vld [vmem:[%s1754_s1 + $0x18] sm:$0xff] }
  0x23   :  { %147 = vmatpush1.msra.mxu0 %v66_v39  ;;  %218 = vmatpush1.msra.mxu1 %v68_v40  ;;  %v42_v63 = vld [vmem:[%s1754_s1] sm:$0xff]  ;;  %v44_v0 = vld [vmem:[%s1754_s1 + $0x10] sm:$0xff]  ;;  %v359_v2 = vld [vmem:[#allocation2 + $0x1e8] sm:$0xff] }
  0x24   :  { %148 = vmatprep.subr.mxu0 %v63_v41  ;;  %219 = vmatprep.subr.mxu1 %v65_v42  ;;  %v41_v1 = vld [vmem:[%s1753_s0] sm:$0x3]  ;;  %v487_v3 = vld [vmem:[#allocation2 + $0x5e8] sm:$0xff] }
  0x25   :  { %149 = vmatpush1.msra.mxu0 %v62_v43  ;;  %220 = vmatpush1.msra.mxu1 %v64_v44  ;;  %v358_v4 = vld [vmem:[#allocation2 + $0x1e0] sm:$0xff]  ;;  %v355_v6 = vld [vmem:[#allocation2 + $0x1c8] sm:$0xff] }
  0x26   :  { %150 = vmatprep.subr.mxu0 %v59_v45  ;;  %221 = vmatprep.subr.mxu1 %v61_v46  ;;  %v486_v5 = vld [vmem:[#allocation2 + $0x5e0] sm:$0xff]  ;;  %v483_v7 = vld [vmem:[#allocation2 + $0x5c8] sm:$0xff] }
  0x27   :  { %151 = vmatpush1.msra.mxu0 %v58_v47  ;;  %222 = vmatpush1.msra.mxu1 %v60_v48  ;;  %v354_v8 = vld [vmem:[#allocation2 + $0x1c0] sm:$0xff]  ;;  %v351_v10 = vld [vmem:[#allocation2 + $0x1a8] sm:$0xff] }
  0x28   :  { %152 = vmatprep.subr.mxu0 %v55_v49  ;;  %223 = vmatprep.subr.mxu1 %v57_v50  ;;  %v482_v9 = vld [vmem:[#allocation2 + $0x5c0] sm:$0xff]  ;;  %v479_v11 = vld [vmem:[#allocation2 + $0x5a8] sm:$0xff] }
  0x29   :  { %153 = vmatpush1.msra.mxu0 %v54_v51  ;;  %224 = vmatpush1.msra.mxu1 %v56_v52  ;;  %v350_v12 = vld [vmem:[#allocation2 + $0x1a0] sm:$0xff]  ;;  %v347_v14 = vld [vmem:[#allocation2 + $0x188] sm:$0xff] }
  0x2a   :  { %154 = vmatprep.subr.mxu0 %v51_v53  ;;  %225 = vmatprep.subr.mxu1 %v53_v54  ;;  %v478_v13 = vld [vmem:[#allocation2 + $0x5a0] sm:$0xff]  ;;  %v475_v15 = vld [vmem:[#allocation2 + $0x588] sm:$0xff] }
  0x2b   :  { %155 = vmatpush1.msra.mxu0 %v50_v55  ;;  %226 = vmatpush1.msra.mxu1 %v52_v56  ;;  %v346_v16 = vld [vmem:[#allocation2 + $0x180] sm:$0xff]  ;;  %v343_v18 = vld [vmem:[#allocation2 + $0x168] sm:$0xff] }
  0x2c   :  { %156 = vmatprep.subr.mxu0 %v47_v57  ;;  %227 = vmatprep.subr.mxu1 %v49_v58  ;;  %v474_v17 = vld [vmem:[#allocation2 + $0x580] sm:$0xff]  ;;  %v471_v19 = vld [vmem:[#allocation2 + $0x568] sm:$0xff] }
  0x2d   :  { %157 = vmatpush1.msra.mxu0 %v46_v59  ;;  %228 = vmatpush1.msra.mxu1 %v48_v60  ;;  %v342_v20 = vld [vmem:[#allocation2 + $0x160] sm:$0xff]  ;;  %v339_v22 = vld [vmem:[#allocation2 + $0x148] sm:$0xff] }
  0x2e   :  { %158 = vmatprep.subr.mxu0 %v43_v61  ;;  %229 = vmatprep.subr.mxu1 %v45_v62  ;;  %v470_v21 = vld [vmem:[#allocation2 + $0x560] sm:$0xff]  ;;  %v467_v23 = vld [vmem:[#allocation2 + $0x548] sm:$0xff] }
  0x2f   :  { %159 = vmatpush1.msra.mxu0 %v42_v63  ;;  %230 = vmatpush1.msra.mxu1 %v44_v0  ;;  %v338_v24 = vld [vmem:[#allocation2 + $0x140] sm:$0xff]  ;;  %v335_v26 = vld [vmem:[#allocation2 + $0x128] sm:$0xff] }
  0x30   :  { %193 = vmatmul.mubr.f32.vlgmr.msra.gmra.mxu0 %v41_v1  ;;  %264 = vmatmul.mubr.f32.vlgmr.msra.gmra.mxu1 %v41_v1  ;;  %v466_v25 = vld [vmem:[#allocation2 + $0x540] sm:$0xff]  ;;  %v463_v27 = vld [vmem:[#allocation2 + $0x528] sm:$0xff] }
  0x31   :  { %576 = vmatprep.subr.mxu0 %v359_v2  ;;  %647 = vmatprep.subr.mxu1 %v487_v3  ;;  %v334_v28 = vld [vmem:[#allocation2 + $0x120] sm:$0xff]  ;;  %v331_v30 = vld [vmem:[#allocation2 + $0x108] sm:$0xff] }
  0x32   :  { %577 = vmatpush1.msra.mxu0 %v358_v4  ;;  %648 = vmatpush1.msra.mxu1 %v486_v5  ;;  %v462_v29 = vld [vmem:[#allocation2 + $0x520] sm:$0xff]  ;;  %v459_v31 = vld [vmem:[#allocation2 + $0x508] sm:$0xff] }
  0x33   :  { %578 = vmatprep.subr.mxu0 %v355_v6  ;;  %649 = vmatprep.subr.mxu1 %v483_v7  ;;  %v330_v32 = vld [vmem:[#allocation2 + $0x100] sm:$0xff]  ;;  %v327_v34 = vld [vmem:[#allocation2 + $0xe8] sm:$0xff] }
  0x34   :  { %579 = vmatpush1.msra.mxu0 %v354_v8  ;;  %650 = vmatpush1.msra.mxu1 %v482_v9  ;;  %v458_v33 = vld [vmem:[#allocation2 + $0x500] sm:$0xff]  ;;  %v455_v35 = vld [vmem:[#allocation2 + $0x4e8] sm:$0xff] }
  0x35   :  { %580 = vmatprep.subr.mxu0 %v351_v10  ;;  %651 = vmatprep.subr.mxu1 %v479_v11  ;;  %v326_v36 = vld [vmem:[#allocation2 + $0xe0] sm:$0xff]  ;;  %v323_v38 = vld [vmem:[#allocation2 + $0xc8] sm:$0xff] }
  0x36   :  { %581 = vmatpush1.msra.mxu0 %v350_v12  ;;  %652 = vmatpush1.msra.mxu1 %v478_v13  ;;  %v454_v37 = vld [vmem:[#allocation2 + $0x4e0] sm:$0xff]  ;;  %v451_v39 = vld [vmem:[#allocation2 + $0x4c8] sm:$0xff] }
  0x37   :  { %582 = vmatprep.subr.mxu0 %v347_v14  ;;  %653 = vmatprep.subr.mxu1 %v475_v15  ;;  %v322_v40 = vld [vmem:[#allocation2 + $0xc0] sm:$0xff]  ;;  %v319_v42 = vld [vmem:[#allocation2 + $0xa8] sm:$0xff] }
  0x38   :  { %583 = vmatpush1.msra.mxu0 %v346_v16  ;;  %654 = vmatpush1.msra.mxu1 %v474_v17  ;;  %v450_v41 = vld [vmem:[#allocation2 + $0x4c0] sm:$0xff]  ;;  %v447_v43 = vld [vmem:[#allocation2 + $0x4a8] sm:$0xff] }
  0x39   :  { %584 = vmatprep.subr.mxu0 %v343_v18  ;;  %655 = vmatprep.subr.mxu1 %v471_v19  ;;  %v318_v44 = vld [vmem:[#allocation2 + $0xa0] sm:$0xff]  ;;  %v315_v46 = vld [vmem:[#allocation2 + $0x88] sm:$0xff] }
  0x3a   :  { %585 = vmatpush1.msra.mxu0 %v342_v20  ;;  %656 = vmatpush1.msra.mxu1 %v470_v21  ;;  %v446_v45 = vld [vmem:[#allocation2 + $0x4a0] sm:$0xff]  ;;  %v443_v47 = vld [vmem:[#allocation2 + $0x488] sm:$0xff] }
  0x3b   :  { %586 = vmatprep.subr.mxu0 %v339_v22  ;;  %657 = vmatprep.subr.mxu1 %v467_v23  ;;  %v314_v48 = vld [vmem:[#allocation2 + $0x80] sm:$0xff]  ;;  %v311_v50 = vld [vmem:[#allocation2 + $0x68] sm:$0xff] }
  0x3c   :  { %587 = vmatpush1.msra.mxu0 %v338_v24  ;;  %658 = vmatpush1.msra.mxu1 %v466_v25  ;;  %v442_v49 = vld [vmem:[#allocation2 + $0x480] sm:$0xff]  ;;  %v439_v51 = vld [vmem:[#allocation2 + $0x468] sm:$0xff] }
  0x3d   :  { %588 = vmatprep.subr.mxu0 %v335_v26  ;;  %659 = vmatprep.subr.mxu1 %v463_v27  ;;  %v310_v52 = vld [vmem:[#allocation2 + $0x60] sm:$0xff]  ;;  %v307_v54 = vld [vmem:[#allocation2 + $0x48] sm:$0xff] }
  0x3e   :  { %589 = vmatpush1.msra.mxu0 %v334_v28  ;;  %660 = vmatpush1.msra.mxu1 %v462_v29  ;;  %v438_v53 = vld [vmem:[#allocation2 + $0x460] sm:$0xff]  ;;  %v435_v55 = vld [vmem:[#allocation2 + $0x448] sm:$0xff] }
  0x3f   :  { %590 = vmatprep.subr.mxu0 %v331_v30  ;;  %661 = vmatprep.subr.mxu1 %v459_v31  ;;  %v306_v56 = vld [vmem:[#allocation2 + $0x40] sm:$0xff]  ;;  %v303_v58 = vld [vmem:[#allocation2 + $0x28] sm:$0xff] }
  0x40   :  { %591 = vmatpush1.msra.mxu0 %v330_v32  ;;  %662 = vmatpush1.msra.mxu1 %v458_v33  ;;  %v434_v57 = vld [vmem:[#allocation2 + $0x440] sm:$0xff]  ;;  %v431_v59 = vld [vmem:[#allocation2 + $0x428] sm:$0xff] }
  0x41   :  { %592 = vmatprep.subr.mxu0 %v327_v34  ;;  %663 = vmatprep.subr.mxu1 %v455_v35  ;;  %v302_v60 = vld [vmem:[#allocation2 + $0x20] sm:$0xff]  ;;  %v299_v62 = vld [vmem:[#allocation2 + $0x8] sm:$0xff] }
  0x42   :  { %593 = vmatpush1.msra.mxu0 %v326_v36  ;;  %664 = vmatpush1.msra.mxu1 %v454_v37  ;;  %v430_v61 = vld [vmem:[#allocation2 + $0x420] sm:$0xff]  ;;  %v427_v63 = vld [vmem:[#allocation2 + $0x408] sm:$0xff] }
  0x43   :  { %594 = vmatprep.subr.mxu0 %v323_v38  ;;  %665 = vmatprep.subr.mxu1 %v451_v39  ;;  %v298_v0 = vld [vmem:[#allocation2] sm:$0xff]  ;;  %v423_v2 = vld [vmem:[#allocation2 + $0x3e8] sm:$0xff] }
  0x44   :  { %595 = vmatpush1.msra.mxu0 %v322_v40  ;;  %666 = vmatpush1.msra.mxu1 %v450_v41  ;;  %v426_v1 = vld [vmem:[#allocation2 + $0x400] sm:$0xff]  ;;  %v551_v3 = vld [vmem:[#allocation2 + $0x7e8] sm:$0xff] }
  0x45   :  { %596 = vmatprep.subr.mxu0 %v319_v42  ;;  %667 = vmatprep.subr.mxu1 %v447_v43  ;;  %v422_v4 = vld [vmem:[#allocation2 + $0x3e0] sm:$0xff]  ;;  %v419_v6 = vld [vmem:[#allocation2 + $0x3c8] sm:$0xff] }
  0x46   :  { %597 = vmatpush1.msra.mxu0 %v318_v44  ;;  %668 = vmatpush1.msra.mxu1 %v446_v45  ;;  %v550_v5 = vld [vmem:[#allocation2 + $0x7e0] sm:$0xff]  ;;  %v547_v7 = vld [vmem:[#allocation2 + $0x7c8] sm:$0xff] }
  0x47   :  { %598 = vmatprep.subr.mxu0 %v315_v46  ;;  %669 = vmatprep.subr.mxu1 %v443_v47  ;;  %v418_v8 = vld [vmem:[#allocation2 + $0x3c0] sm:$0xff]  ;;  %v415_v10 = vld [vmem:[#allocation2 + $0x3a8] sm:$0xff] }
  0x48   :  { %599 = vmatpush1.msra.mxu0 %v314_v48  ;;  %670 = vmatpush1.msra.mxu1 %v442_v49  ;;  %v546_v9 = vld [vmem:[#allocation2 + $0x7c0] sm:$0xff]  ;;  %v543_v11 = vld [vmem:[#allocation2 + $0x7a8] sm:$0xff] }
  0x49   :  { %600 = vmatprep.subr.mxu0 %v311_v50  ;;  %671 = vmatprep.subr.mxu1 %v439_v51  ;;  %v414_v12 = vld [vmem:[#allocation2 + $0x3a0] sm:$0xff]  ;;  %v411_v14 = vld [vmem:[#allocation2 + $0x388] sm:$0xff] }
  0x4a   :  { %601 = vmatpush1.msra.mxu0 %v310_v52  ;;  %672 = vmatpush1.msra.mxu1 %v438_v53  ;;  %v542_v13 = vld [vmem:[#allocation2 + $0x7a0] sm:$0xff]  ;;  %v539_v15 = vld [vmem:[#allocation2 + $0x788] sm:$0xff] }
  0x4b   :  { %602 = vmatprep.subr.mxu0 %v307_v54  ;;  %673 = vmatprep.subr.mxu1 %v435_v55  ;;  %v410_v16 = vld [vmem:[#allocation2 + $0x380] sm:$0xff]  ;;  %v407_v18 = vld [vmem:[#allocation2 + $0x368] sm:$0xff] }
  0x4c   :  { %603 = vmatpush1.msra.mxu0 %v306_v56  ;;  %674 = vmatpush1.msra.mxu1 %v434_v57  ;;  %v538_v17 = vld [vmem:[#allocation2 + $0x780] sm:$0xff]  ;;  %v535_v19 = vld [vmem:[#allocation2 + $0x768] sm:$0xff] }
  0x4d   :  { %604 = vmatprep.subr.mxu0 %v303_v58  ;;  %675 = vmatprep.subr.mxu1 %v431_v59  ;;  %v406_v20 = vld [vmem:[#allocation2 + $0x360] sm:$0xff]  ;;  %v403_v22 = vld [vmem:[#allocation2 + $0x348] sm:$0xff] }
  0x4e   :  { %605 = vmatpush1.msra.mxu0 %v302_v60  ;;  %676 = vmatpush1.msra.mxu1 %v430_v61  ;;  %v534_v21 = vld [vmem:[#allocation2 + $0x760] sm:$0xff]  ;;  %v531_v23 = vld [vmem:[#allocation2 + $0x748] sm:$0xff] }
  0x4f   :  { %606 = vmatprep.subr.mxu0 %v299_v62  ;;  %677 = vmatprep.subr.mxu1 %v427_v63  ;;  %v402_v24 = vld [vmem:[#allocation2 + $0x340] sm:$0xff]  ;;  %v399_v26 = vld [vmem:[#allocation2 + $0x328] sm:$0xff] }
  0x50   :  { %607 = vmatpush1.msra.mxu0 %v298_v0  ;;  %678 = vmatpush1.msra.mxu1 %v426_v1  ;;  %v530_v25 = vld [vmem:[#allocation2 + $0x740] sm:$0xff]  ;;  %v527_v27 = vld [vmem:[#allocation2 + $0x728] sm:$0xff] }
  0x51   :  { %608 = vmatprep.subr.mxu0 %v423_v2  ;;  %679 = vmatprep.subr.mxu1 %v551_v3  ;;  %v398_v28 = vld [vmem:[#allocation2 + $0x320] sm:$0xff]  ;;  %v395_v30 = vld [vmem:[#allocation2 + $0x308] sm:$0xff]  ;;  %v361_v2 = vld [vmem:[#allocation2 + $0x1f8] sm:$0xff] }
  0x52   :  { %609 = vmatpush2.msra.mxu0 %v422_v4  ;;  %680 = vmatpush2.msra.mxu1 %v550_v5  ;;  %v526_v29 = vld [vmem:[#allocation2 + $0x720] sm:$0xff]  ;;  %v523_v31 = vld [vmem:[#allocation2 + $0x708] sm:$0xff]  ;;  %v489_v3 = vld [vmem:[#allocation2 + $0x5f8] sm:$0xff]  ;;  %v108_v4 = vlaneseq }
  0x53   :  { %610 = vmatprep.subr.mxu0 %v419_v6  ;;  %681 = vmatprep.subr.mxu1 %v547_v7  ;;  %v394_v32 = vld [vmem:[#allocation2 + $0x300] sm:$0xff]  ;;  %v391_v34 = vld [vmem:[#allocation2 + $0x2e8] sm:$0xff] }
  0x54   :  { %611 = vmatpush2.msra.mxu0 %v418_v8  ;;  %682 = vmatpush2.msra.mxu1 %v546_v9  ;;  %v522_v33 = vld [vmem:[#allocation2 + $0x700] sm:$0xff]  ;;  %v519_v35 = vld [vmem:[#allocation2 + $0x6e8] sm:$0xff]  ;;  %v1519_v5 = vshrl.u32 %v108_v4, 7  ;;  %v464_v4 = vld [vmem:[#allocation2 + $0x530] sm:$0xff] }
  0x55   :  { %612 = vmatprep.subr.mxu0 %v415_v10  ;;  %683 = vmatprep.subr.mxu1 %v543_v11  ;;  %v390_v36 = vld [vmem:[#allocation2 + $0x2e0] sm:$0xff]  ;;  %v387_v38 = vld [vmem:[#allocation2 + $0x2c8] sm:$0xff] }
  0x56   :  { %613 = vmatpush2.msra.mxu0 %v414_v12  ;;  %684 = vmatpush2.msra.mxu1 %v542_v13  ;;  %v518_v37 = vld [vmem:[#allocation2 + $0x6e0] sm:$0xff]  ;;  %v515_v39 = vld [vmem:[#allocation2 + $0x6c8] sm:$0xff]  ;;  %v110_v6 = vsub.s32 0, %v1519_v5  ;;  %v118_v7 = vsub.s32 2, %v1519_v5  ;;  %v114_v9 = vsub.s32 1, %v1519_v5  ;;  %v122_v10 = vsub.s32 3, %v1519_v5 }
  0x57   :  { %614 = vmatprep.subr.mxu0 %v411_v14  ;;  %685 = vmatprep.subr.mxu1 %v539_v15  ;;  %v386_v40 = vld [vmem:[#allocation2 + $0x2c0] sm:$0xff]  ;;  %v383_v42 = vld [vmem:[#allocation2 + $0x2a8] sm:$0xff] }
  0x58   :  { %615 = vmatpush2.msra.mxu0 %v410_v16  ;;  %686 = vmatpush2.msra.mxu1 %v538_v17  ;;  %v514_v41 = vld [vmem:[#allocation2 + $0x6c0] sm:$0xff]  ;;  %v511_v43 = vld [vmem:[#allocation2 + $0x6a8] sm:$0xff] }
  0x59   :  { %616 = vmatprep.subr.mxu0 %v407_v18  ;;  %687 = vmatprep.subr.mxu1 %v535_v19  ;;  %v382_v44 = vld [vmem:[#allocation2 + $0x2a0] sm:$0xff]  ;;  %v379_v46 = vld [vmem:[#allocation2 + $0x288] sm:$0xff] }
  0x5a   :  { %617 = vmatpush2.msra.mxu0 %v406_v20  ;;  %688 = vmatpush2.msra.mxu1 %v534_v21  ;;  %v510_v45 = vld [vmem:[#allocation2 + $0x6a0] sm:$0xff]  ;;  %v507_v47 = vld [vmem:[#allocation2 + $0x688] sm:$0xff] }
  0x5b   :  { %618 = vmatprep.subr.mxu0 %v403_v22  ;;  %689 = vmatprep.subr.mxu1 %v531_v23  ;;  %v378_v48 = vld [vmem:[#allocation2 + $0x280] sm:$0xff]  ;;  %v375_v50 = vld [vmem:[#allocation2 + $0x268] sm:$0xff] }
  0x5c   :  { %619 = vmatpush2.msra.mxu0 %v402_v24  ;;  %690 = vmatpush2.msra.mxu1 %v530_v25  ;;  %v506_v49 = vld [vmem:[#allocation2 + $0x680] sm:$0xff]  ;;  %v503_v51 = vld [vmem:[#allocation2 + $0x668] sm:$0xff] }
  0x5d   :  { %620 = vmatprep.subr.mxu0 %v399_v26  ;;  %691 = vmatprep.subr.mxu1 %v527_v27  ;;  %v374_v52 = vld [vmem:[#allocation2 + $0x260] sm:$0xff]  ;;  %v371_v54 = vld [vmem:[#allocation2 + $0x248] sm:$0xff] }
  0x5e   :  { %621 = vmatpush2.msra.mxu0 %v398_v28  ;;  %692 = vmatpush2.msra.mxu1 %v526_v29  ;;  %v502_v53 = vld [vmem:[#allocation2 + $0x660] sm:$0xff]  ;;  %v499_v55 = vld [vmem:[#allocation2 + $0x648] sm:$0xff] }
  0x5f   :  { %622 = vmatprep.subr.mxu0 %v395_v30  ;;  %693 = vmatprep.subr.mxu1 %v523_v31  ;;  %v370_v56 = vld [vmem:[#allocation2 + $0x240] sm:$0xff]  ;;  %v367_v58 = vld [vmem:[#allocation2 + $0x228] sm:$0xff] }
  0x60   :  { %623 = vmatpush2.msra.mxu0 %v394_v32  ;;  %694 = vmatpush2.msra.mxu1 %v522_v33  ;;  %v498_v57 = vld [vmem:[#allocation2 + $0x640] sm:$0xff]  ;;  %v495_v59 = vld [vmem:[#allocation2 + $0x628] sm:$0xff] }
  0x61   :  { %624 = vmatprep.subr.mxu0 %v391_v34  ;;  %695 = vmatprep.subr.mxu1 %v519_v35  ;;  %v366_v60 = vld [vmem:[#allocation2 + $0x220] sm:$0xff]  ;;  %v363_v62 = vld [vmem:[#allocation2 + $0x208] sm:$0xff] }
  0x62   :  { %625 = vmatpush2.msra.mxu0 %v390_v36  ;;  %696 = vmatpush2.msra.mxu1 %v518_v37  ;;  %v494_v61 = vld [vmem:[#allocation2 + $0x620] sm:$0xff]  ;;  %v491_v63 = vld [vmem:[#allocation2 + $0x608] sm:$0xff] }
  0x63   :  { %626 = vmatprep.subr.mxu0 %v387_v38  ;;  %697 = vmatprep.subr.mxu1 %v515_v39  ;;  %v362_v0 = vld [vmem:[#allocation2 + $0x200] sm:$0xff] }
  0x64   :  { %627 = vmatpush2.msra.mxu0 %v386_v40  ;;  %698 = vmatpush2.msra.mxu1 %v514_v41  ;;  %v490_v1 = vld [vmem:[#allocation2 + $0x600] sm:$0xff] }
  0x65   :  { %628 = vmatprep.subr.mxu0 %v383_v42  ;;  %699 = vmatprep.subr.mxu1 %v511_v43  ;;  %v106_v8 = vld [vmem:[%s1755_s2] sm:$0xf]  ;;  %v360_v42 = vld [vmem:[#allocation2 + $0x1f0] sm:$0xff] }
  0x66   :  { %629 = vmatpush2.msra.mxu0 %v382_v44  ;;  %700 = vmatpush2.msra.mxu1 %v510_v45  ;;  %v111_v11 = vrot.slane %v106_v8, %v110_v6  ;;  %v119_v12 = vrot.slane %v106_v8, %v118_v7  ;;  %v115_v13 = vrot.slane %v106_v8, %v114_v9  ;;  %v488_v44 = vld [vmem:[#allocation2 + $0x5f0] sm:$0xff]  ;;  %v357_v45 = vld [vmem:[#allocation2 + $0x1d8] sm:$0xff] }
  0x67   :  { %630 = vmatprep.subr.mxu0 %v379_v46  ;;  %701 = vmatprep.subr.mxu1 %v507_v47  ;;  %v123_v14 = vrot.slane %v106_v8, %v122_v10  ;;  %v485_v46 = vld [vmem:[#allocation2 + $0x5d8] sm:$0xff]  ;;  %v356_v47 = vld [vmem:[#allocation2 + $0x1d0] sm:$0xff] }
  0x68   :  { %631 = vmatpush2.msra.mxu0 %v378_v48  ;;  %702 = vmatpush2.msra.mxu1 %v506_v49  ;;  %v484_v48 = vld [vmem:[#allocation2 + $0x5d0] sm:$0xff]  ;;  %v353_v49 = vld [vmem:[#allocation2 + $0x1b8] sm:$0xff] }
  0x69   :  { %632 = vmatprep.subr.mxu0 %v375_v50  ;;  %703 = vmatprep.subr.mxu1 %v503_v51  ;;  %v481_v50 = vld [vmem:[#allocation2 + $0x5b8] sm:$0xff]  ;;  %v352_v51 = vld [vmem:[#allocation2 + $0x1b0] sm:$0xff] }
  0x6a   :  { %633 = vmatpush2.msra.mxu0 %v374_v52  ;;  %704 = vmatpush2.msra.mxu1 %v502_v53  ;;  %v480_v52 = vld [vmem:[#allocation2 + $0x5b0] sm:$0xff]  ;;  %v349_v53 = vld [vmem:[#allocation2 + $0x198] sm:$0xff] }
  0x6b   :  { %634 = vmatprep.subr.mxu0 %v371_v54  ;;  %705 = vmatprep.subr.mxu1 %v499_v55  ;;  %v477_v54 = vld [vmem:[#allocation2 + $0x598] sm:$0xff]  ;;  %v348_v55 = vld [vmem:[#allocation2 + $0x190] sm:$0xff] }
  0x6c   :  { %635 = vmatpush2.msra.mxu0 %v370_v56  ;;  %706 = vmatpush2.msra.mxu1 %v498_v57  ;;  %v476_v56 = vld [vmem:[#allocation2 + $0x590] sm:$0xff]  ;;  %v345_v57 = vld [vmem:[#allocation2 + $0x178] sm:$0xff] }
  0x6d   :  { %636 = vmatprep.subr.mxu0 %v367_v58  ;;  %707 = vmatprep.subr.mxu1 %v495_v59  ;;  %v473_v58 = vld [vmem:[#allocation2 + $0x578] sm:$0xff]  ;;  %v344_v59 = vld [vmem:[#allocation2 + $0x170] sm:$0xff] }
  0x6e   :  { %637 = vmatpush2.msra.mxu0 %v366_v60  ;;  %708 = vmatpush2.msra.mxu1 %v494_v61  ;;  %v472_v60 = vld [vmem:[#allocation2 + $0x570] sm:$0xff]  ;;  %v341_v61 = vld [vmem:[#allocation2 + $0x158] sm:$0xff] }
  0x6f   :  { %638 = vmatprep.subr.mxu0 %v363_v62  ;;  %709 = vmatprep.subr.mxu1 %v491_v63  ;;  %v469_v62 = vld [vmem:[#allocation2 + $0x558] sm:$0xff]  ;;  %v340_v63 = vld [vmem:[#allocation2 + $0x150] sm:$0xff] }
  0x70   :  { %639 = vmatpush2.msra.mxu0 %v362_v0  ;;  %710 = vmatpush2.msra.mxu1 %v490_v1  ;;  %v468_v0 = vld [vmem:[#allocation2 + $0x550] sm:$0xff]  ;;  %v337_v1 = vld [vmem:[#allocation2 + $0x138] sm:$0xff] }
  0x71   :  { %718 = vmatprep.subr.mxu0 %v361_v2  ;;  %789 = vmatprep.subr.mxu1 %v489_v3  ;;  %v465_v2 = vld [vmem:[#allocation2 + $0x538] sm:$0xff]  ;;  %v336_v3 = vld [vmem:[#allocation2 + $0x130] sm:$0xff] }
  0x72   :  { %v333_v8 = vld [vmem:[#allocation2 + $0x118] sm:$0xff] }
  0xf0   :  { %v194_v15 = vpop.f32.mrf.mxu0  ;;  %v265_v16 = vpop.f32.mrf.mxu1 }
  0xf1   :  { %v195_v17 = vadd.f32 %v194_v15, %v111_v11  ;;  %v266_v18 = vadd.f32 %v265_v16, %v119_v12  ;;  %v461_v11 = vld [vmem:[#allocation2 + $0x518] sm:$0xff]  ;;  %v332_v12 = vld [vmem:[#allocation2 + $0x110] sm:$0xff] }
  0xf2   :  { %v196_v19 = vpop.f32.mrf.mxu0  ;;  %v267_v20 = vpop.f32.mrf.mxu1  ;;  %v457_v15 = vld [vmem:[#allocation2 + $0x4f8] sm:$0xff]  ;;  %v328_v16 = vld [vmem:[#allocation2 + $0xf0] sm:$0xff] }
  0xf3   :  { %v1116_v21 = vmul.f32 -1.442695, %v195_v17  ;;  %v1118_v22 = vmul.f32 -1.442695, %v266_v18  ;;  %v197_v23 = vadd.f32 %v196_v19, %v115_v13  ;;  %v268_v24 = vadd.f32 %v267_v20, %v123_v14  ;;  %v460_v13 = vld [vmem:[#allocation2 + $0x510] sm:$0xff]  ;;  %v329_v14 = vld [vmem:[#allocation2 + $0xf8] sm:$0xff] }
  0xf4   :  { %v453_v19 = vld [vmem:[#allocation2 + $0x4d8] sm:$0xff]  ;;  %v324_v20 = vld [vmem:[#allocation2 + $0xd0] sm:$0xff] }
  0xf5   :  { %1200 = vpow2.f32 %v1116_v21  ;;  %v1117_v25 = vmul.f32 -1.442695, %v197_v23  ;;  %v1119_v26 = vmul.f32 -1.442695, %v268_v24  ;;  %v452_v21 = vld [vmem:[#allocation2 + $0x4d0] sm:$0xff] }
  0xf6   :  { %1202 = vpow2.f32 %v1118_v22  ;;  %v321_v22 = vld [vmem:[#allocation2 + $0xb8] sm:$0xff] }
  0xf7   :  { %1204 = vpow2.f32 %v1117_v25  ;;  %v448_v25 = vld [vmem:[#allocation2 + $0x4b0] sm:$0xff] }
  0xf8   :  { %1206 = vpow2.f32 %v1119_v26  ;;  %v317_v26 = vld [vmem:[#allocation2 + $0x98] sm:$0xff] }
 0x102   :  { %v1201_v27 = vpop.eup %1200 }
 0x103   :  { %v1203_v28 = vpop.eup %1202  ;;  %v282_v29 = vadd.f32 1.0, %v1201_v27  ;;  %v445_v27 = vld [vmem:[#allocation2 + $0x498] sm:$0xff] }
 0x104   :  { %v1205_v30 = vpop.eup %1204  ;;  %v284_v31 = vadd.f32 1.0, %v1203_v28  ;;  %v316_v28 = vld [vmem:[#allocation2 + $0x90] sm:$0xff] }
 0x105   :  { %v1207_v32 = vpop.eup %1206  ;;  %1208 = vrcp.f32 %v282_v29  ;;  %v283_v33 = vadd.f32 1.0, %v1205_v30  ;;  %v444_v29 = vld [vmem:[#allocation2 + $0x490] sm:$0xff]  ;;  %v313_v30 = vld [vmem:[#allocation2 + $0x78] sm:$0xff] }
 0x106   :  { %1210 = vrcp.f32 %v284_v31  ;;  %v285_v34 = vadd.f32 1.0, %v1207_v32  ;;  %v441_v31 = vld [vmem:[#allocation2 + $0x478] sm:$0xff]  ;;  %v312_v32 = vld [vmem:[#allocation2 + $0x70] sm:$0xff] }
 0x107   :  { %1212 = vrcp.f32 %v283_v33  ;;  %v440_v33 = vld [vmem:[#allocation2 + $0x470] sm:$0xff] }
 0x108   :  { %1214 = vrcp.f32 %v285_v34  ;;  %v309_v34 = vld [vmem:[#allocation2 + $0x58] sm:$0xff] }
 0x112   :  { %v1209_v35 = vpop.eup %1208 }
 0x113   :  { %v1211_v36 = vpop.eup %1210  ;;  %v1536_v40 = vmul.f32 %v1209_v35, %v195_v17  ;;  %v456_v17 = vld [vmem:[#allocation2 + $0x4f0] sm:$0xff]  ;;  %v437_v35 = vld [vmem:[#allocation2 + $0x458] sm:$0xff] }
 0x114   :  { %v1213_v37 = vpop.eup %1212  ;;  %v1538_v43 = vmul.f32 %v1211_v36, %v266_v18  ;;  %v325_v18 = vld [vmem:[#allocation2 + $0xd8] sm:$0xff]  ;;  %v308_v36 = vld [vmem:[#allocation2 + $0x50] sm:$0xff] }
 0x115   :  { %v1215_v38 = vpop.eup %1214  ;;  %v295_v39 = vmul.f32 %v1213_v37, %v197_v23  ;;  %v449_v23 = vld [vmem:[#allocation2 + $0x4b8] sm:$0xff]  ;;  %v436_v37 = vld [vmem:[#allocation2 + $0x450] sm:$0xff] }
 0x116   :  { %v297_v41 = vmul.f32 %v1215_v38, %v268_v24  ;;  %v320_v24 = vld [vmem:[#allocation2 + $0xb0] sm:$0xff]  ;;  %v305_v38 = vld [vmem:[#allocation2 + $0x38] sm:$0xff] }
 0x117   :  { %640 = vmatprep.mubr.f32.mxu0 %v295_v39 }
 0x118   :  { %711 = vmatprep.mubr.f32.mxu1 %v297_v41  ;;  %641 = vmatmul.mubr.f32.vlgmr.msra.gmra.mxu0 %v1536_v40 }
 0x119   :  { %712 = vmatmul.mubr.f32.vlgmr.msra.gmra.mxu1 %v1538_v43  ;;  %719 = vmatpush1.msra.mxu0 %v360_v42  ;;  %v432_v42 = vld [vmem:[#allocation2 + $0x430] sm:$0xff] }
 0x11a   :  { %790 = vmatpush1.msra.mxu1 %v488_v44  ;;  %720 = vmatprep.subr.mxu0 %v357_v45  ;;  %v301_v44 = vld [vmem:[#allocation2 + $0x18] sm:$0xff] }
 0x11b   :  { %782 = vmatprep.mubr.f32.mxu0 %v295_v39  ;;  %791 = vmatprep.subr.mxu1 %v485_v46  ;;  %v433_v39 = vld [vmem:[#allocation2 + $0x438] sm:$0xff]  ;;  %v300_v46 = vld [vmem:[#allocation2 + $0x10] sm:$0xff] }
 0x11c   :  { %853 = vmatprep.mubr.f32.mxu1 %v297_v41  ;;  %721 = vmatpush1.msra.mxu0 %v356_v47  ;;  %v304_v41 = vld [vmem:[#allocation2 + $0x30] sm:$0xff]  ;;  %v429_v45 = vld [vmem:[#allocation2 + $0x418] sm:$0xff] }
 0x11d   :  { %792 = vmatpush1.msra.mxu1 %v484_v48  ;;  %722 = vmatprep.subr.mxu0 %v353_v49  ;;  %v428_v47 = vld [vmem:[#allocation2 + $0x410] sm:$0xff]  ;;  %v425_v48 = vld [vmem:[#allocation2 + $0x3f8] sm:$0xff] }
 0x11e   :  { %793 = vmatprep.subr.mxu1 %v481_v50  ;;  %723 = vmatpush1.msra.mxu0 %v352_v51  ;;  %v553_v49 = vld [vmem:[#allocation2 + $0x7f8] sm:$0xff]  ;;  %v424_v50 = vld [vmem:[#allocation2 + $0x3f0] sm:$0xff] }
 0x11f   :  { %794 = vmatpush1.msra.mxu1 %v480_v52  ;;  %724 = vmatprep.subr.mxu0 %v349_v53  ;;  %v552_v51 = vld [vmem:[#allocation2 + $0x7f0] sm:$0xff]  ;;  %v421_v52 = vld [vmem:[#allocation2 + $0x3d8] sm:$0xff] }
 0x120   :  { %795 = vmatprep.subr.mxu1 %v477_v54  ;;  %725 = vmatpush1.msra.mxu0 %v348_v55  ;;  %v549_v53 = vld [vmem:[#allocation2 + $0x7d8] sm:$0xff]  ;;  %v420_v54 = vld [vmem:[#allocation2 + $0x3d0] sm:$0xff] }
 0x121   :  { %796 = vmatpush1.msra.mxu1 %v476_v56  ;;  %726 = vmatprep.subr.mxu0 %v345_v57  ;;  %v548_v55 = vld [vmem:[#allocation2 + $0x7d0] sm:$0xff]  ;;  %v417_v56 = vld [vmem:[#allocation2 + $0x3b8] sm:$0xff] }
 0x122   :  { %797 = vmatprep.subr.mxu1 %v473_v58  ;;  %727 = vmatpush1.msra.mxu0 %v344_v59  ;;  %v545_v57 = vld [vmem:[#allocation2 + $0x7b8] sm:$0xff]  ;;  %v416_v58 = vld [vmem:[#allocation2 + $0x3b0] sm:$0xff] }
 0x123   :  { %798 = vmatpush1.msra.mxu1 %v472_v60  ;;  %728 = vmatprep.subr.mxu0 %v341_v61  ;;  %v544_v59 = vld [vmem:[#allocation2 + $0x7b0] sm:$0xff]  ;;  %v413_v60 = vld [vmem:[#allocation2 + $0x398] sm:$0xff] }
 0x124   :  { %799 = vmatprep.subr.mxu1 %v469_v62  ;;  %729 = vmatpush1.msra.mxu0 %v340_v63  ;;  %v541_v61 = vld [vmem:[#allocation2 + $0x798] sm:$0xff]  ;;  %v412_v62 = vld [vmem:[#allocation2 + $0x390] sm:$0xff] }
 0x125   :  { %800 = vmatpush1.msra.mxu1 %v468_v0  ;;  %730 = vmatprep.subr.mxu0 %v337_v1  ;;  %v540_v63 = vld [vmem:[#allocation2 + $0x790] sm:$0xff]  ;;  %v409_v0 = vld [vmem:[#allocation2 + $0x378] sm:$0xff] }
 0x126   :  { %801 = vmatprep.subr.mxu1 %v465_v2  ;;  %731 = vmatpush1.msra.mxu0 %v336_v3  ;;  %v537_v1 = vld [vmem:[#allocation2 + $0x778] sm:$0xff]  ;;  %v408_v2 = vld [vmem:[#allocation2 + $0x370] sm:$0xff] }
 0x127   :  { %802 = vmatpush1.msra.mxu1 %v464_v4  ;;  %732 = vmatprep.subr.mxu0 %v333_v8  ;;  %v536_v3 = vld [vmem:[#allocation2 + $0x770] sm:$0xff]  ;;  %v405_v4 = vld [vmem:[#allocation2 + $0x358] sm:$0xff] }
 0x128   :  { %803 = vmatprep.subr.mxu1 %v461_v11  ;;  %733 = vmatpush1.msra.mxu0 %v332_v12  ;;  %v533_v8 = vld [vmem:[#allocation2 + $0x758] sm:$0xff]  ;;  %v404_v11 = vld [vmem:[#allocation2 + $0x350] sm:$0xff] }
 0x129   :  { %804 = vmatpush1.msra.mxu1 %v460_v13  ;;  %734 = vmatprep.subr.mxu0 %v329_v14  ;;  %v532_v12 = vld [vmem:[#allocation2 + $0x750] sm:$0xff]  ;;  %v401_v13 = vld [vmem:[#allocation2 + $0x338] sm:$0xff] }
 0x12a   :  { %805 = vmatprep.subr.mxu1 %v457_v15  ;;  %735 = vmatpush1.msra.mxu0 %v328_v16  ;;  %v529_v14 = vld [vmem:[#allocation2 + $0x738] sm:$0xff]  ;;  %v400_v15 = vld [vmem:[#allocation2 + $0x330] sm:$0xff] }
 0x12b   :  { %806 = vmatpush1.msra.mxu1 %v456_v17  ;;  %736 = vmatprep.subr.mxu0 %v325_v18  ;;  %v528_v16 = vld [vmem:[#allocation2 + $0x730] sm:$0xff]  ;;  %v397_v17 = vld [vmem:[#allocation2 + $0x318] sm:$0xff] }
 0x12c   :  { %807 = vmatprep.subr.mxu1 %v453_v19  ;;  %737 = vmatpush1.msra.mxu0 %v324_v20  ;;  %v525_v18 = vld [vmem:[#allocation2 + $0x718] sm:$0xff]  ;;  %v396_v19 = vld [vmem:[#allocation2 + $0x310] sm:$0xff] }
 0x12d   :  { %808 = vmatpush1.msra.mxu1 %v452_v21  ;;  %738 = vmatprep.subr.mxu0 %v321_v22  ;;  %v524_v20 = vld [vmem:[#allocation2 + $0x710] sm:$0xff]  ;;  %v393_v21 = vld [vmem:[#allocation2 + $0x2f8] sm:$0xff] }
 0x12e   :  { %809 = vmatprep.subr.mxu1 %v449_v23  ;;  %739 = vmatpush1.msra.mxu0 %v320_v24  ;;  %v521_v22 = vld [vmem:[#allocation2 + $0x6f8] sm:$0xff]  ;;  %v392_v23 = vld [vmem:[#allocation2 + $0x2f0] sm:$0xff] }
 0x12f   :  { %810 = vmatpush1.msra.mxu1 %v448_v25  ;;  %740 = vmatprep.subr.mxu0 %v317_v26  ;;  %v520_v24 = vld [vmem:[#allocation2 + $0x6f0] sm:$0xff]  ;;  %v389_v25 = vld [vmem:[#allocation2 + $0x2d8] sm:$0xff] }
 0x130   :  { %811 = vmatprep.subr.mxu1 %v445_v27  ;;  %741 = vmatpush1.msra.mxu0 %v316_v28  ;;  %v517_v26 = vld [vmem:[#allocation2 + $0x6d8] sm:$0xff]  ;;  %v388_v27 = vld [vmem:[#allocation2 + $0x2d0] sm:$0xff] }
 0x131   :  { %812 = vmatpush1.msra.mxu1 %v444_v29  ;;  %742 = vmatprep.subr.mxu0 %v313_v30  ;;  %v516_v28 = vld [vmem:[#allocation2 + $0x6d0] sm:$0xff]  ;;  %v385_v29 = vld [vmem:[#allocation2 + $0x2b8] sm:$0xff] }
 0x132   :  { %813 = vmatprep.subr.mxu1 %v441_v31  ;;  %743 = vmatpush1.msra.mxu0 %v312_v32  ;;  %v513_v30 = vld [vmem:[#allocation2 + $0x6b8] sm:$0xff]  ;;  %v384_v31 = vld [vmem:[#allocation2 + $0x2b0] sm:$0xff] }
 0x133   :  { %814 = vmatpush1.msra.mxu1 %v440_v33  ;;  %744 = vmatprep.subr.mxu0 %v309_v34  ;;  %v512_v32 = vld [vmem:[#allocation2 + $0x6b0] sm:$0xff]  ;;  %v381_v33 = vld [vmem:[#allocation2 + $0x298] sm:$0xff] }
 0x134   :  { %815 = vmatprep.subr.mxu1 %v437_v35  ;;  %745 = vmatpush1.msra.mxu0 %v308_v36  ;;  %v509_v34 = vld [vmem:[#allocation2 + $0x698] sm:$0xff]  ;;  %v380_v35 = vld [vmem:[#allocation2 + $0x290] sm:$0xff] }
 0x135   :  { %816 = vmatpush1.msra.mxu1 %v436_v37  ;;  %746 = vmatprep.subr.mxu0 %v305_v38  ;;  %v508_v36 = vld [vmem:[#allocation2 + $0x690] sm:$0xff]  ;;  %v377_v37 = vld [vmem:[#allocation2 + $0x278] sm:$0xff] }
 0x136   :  { %817 = vmatprep.subr.mxu1 %v433_v39  ;;  %747 = vmatpush1.msra.mxu0 %v304_v41  ;;  %v505_v38 = vld [vmem:[#allocation2 + $0x678] sm:$0xff]  ;;  %v376_v39 = vld [vmem:[#allocation2 + $0x270] sm:$0xff] }
 0x137   :  { %818 = vmatpush1.msra.mxu1 %v432_v42  ;;  %748 = vmatprep.subr.mxu0 %v301_v44  ;;  %v504_v41 = vld [vmem:[#allocation2 + $0x670] sm:$0xff]  ;;  %v373_v42 = vld [vmem:[#allocation2 + $0x258] sm:$0xff] }
 0x138   :  { %819 = vmatprep.subr.mxu1 %v429_v45  ;;  %749 = vmatpush1.msra.mxu0 %v300_v46  ;;  %v501_v44 = vld [vmem:[#allocation2 + $0x658] sm:$0xff]  ;;  %v372_v45 = vld [vmem:[#allocation2 + $0x250] sm:$0xff] }
 0x139   :  { %820 = vmatpush1.msra.mxu1 %v428_v47  ;;  %750 = vmatprep.subr.mxu0 %v425_v48  ;;  %v500_v46 = vld [vmem:[#allocation2 + $0x650] sm:$0xff]  ;;  %v369_v47 = vld [vmem:[#allocation2 + $0x238] sm:$0xff] }
 0x13a   :  { %821 = vmatprep.subr.mxu1 %v553_v49  ;;  %751 = vmatpush2.msra.mxu0 %v424_v50  ;;  %v497_v48 = vld [vmem:[#allocation2 + $0x638] sm:$0xff]  ;;  %v368_v49 = vld [vmem:[#allocation2 + $0x230] sm:$0xff] }
 0x13b   :  { %822 = vmatpush2.msra.mxu1 %v552_v51  ;;  %752 = vmatprep.subr.mxu0 %v421_v52  ;;  %v496_v50 = vld [vmem:[#allocation2 + $0x630] sm:$0xff]  ;;  %v365_v51 = vld [vmem:[#allocation2 + $0x218] sm:$0xff] }
 0x13c   :  { %823 = vmatprep.subr.mxu1 %v549_v53  ;;  %753 = vmatpush2.msra.mxu0 %v420_v54  ;;  %v493_v52 = vld [vmem:[#allocation2 + $0x618] sm:$0xff]  ;;  %v364_v53 = vld [vmem:[#allocation2 + $0x210] sm:$0xff] }
 0x13d   :  { %824 = vmatpush2.msra.mxu1 %v548_v55  ;;  %754 = vmatprep.subr.mxu0 %v417_v56  ;;  %v492_v54 = vld [vmem:[#allocation2 + $0x610] sm:$0xff]  ;;  %v919_v55 = vld [vmem:[%s1758_s5 + $0xf8] sm:$0xff] }
 0x13e   :  { %825 = vmatprep.subr.mxu1 %v545_v57  ;;  %755 = vmatpush2.msra.mxu0 %v416_v58  ;;  %v903_v56 = vld [vmem:[%s1758_s5 + $0x78] sm:$0xff]  ;;  %v918_v57 = vld [vmem:[%s1758_s5 + $0xf0] sm:$0xff]  ;;  %v901_v58 = vld [vmem:[%s1758_s5 + $0x68] sm:$0xff] }
 0x13f   :  { %826 = vmatpush2.msra.mxu1 %v544_v59  ;;  %756 = vmatprep.subr.mxu0 %v413_v60  ;;  %v916_v59 = vld [vmem:[%s1758_s5 + $0xe0] sm:$0xff] }
 0x140   :  { %827 = vmatprep.subr.mxu1 %v541_v61  ;;  %757 = vmatpush2.msra.mxu0 %v412_v62  ;;  %v900_v60 = vld [vmem:[%s1758_s5 + $0x60] sm:$0xff]  ;;  %v915_v61 = vld [vmem:[%s1758_s5 + $0xd8] sm:$0xff] }
 0x141   :  { %828 = vmatpush2.msra.mxu1 %v540_v63  ;;  %758 = vmatprep.subr.mxu0 %v409_v0  ;;  %v899_v62 = vld [vmem:[%s1758_s5 + $0x58] sm:$0xff]  ;;  %v914_v63 = vld [vmem:[%s1758_s5 + $0xd0] sm:$0xff] }
 0x142   :  { %829 = vmatprep.subr.mxu1 %v537_v1  ;;  %759 = vmatpush2.msra.mxu0 %v408_v2  ;;  %v898_v0 = vld [vmem:[%s1758_s5 + $0x50] sm:$0xff]  ;;  %v913_v1 = vld [vmem:[%s1758_s5 + $0xc8] sm:$0xff] }
 0x143   :  { %830 = vmatpush2.msra.mxu1 %v536_v3  ;;  %760 = vmatprep.subr.mxu0 %v405_v4  ;;  %v897_v2 = vld [vmem:[%s1758_s5 + $0x48] sm:$0xff]  ;;  %v912_v3 = vld [vmem:[%s1758_s5 + $0xc0] sm:$0xff] }
 0x144   :  { %831 = vmatprep.subr.mxu1 %v533_v8  ;;  %761 = vmatpush2.msra.mxu0 %v404_v11  ;;  %v896_v4 = vld [vmem:[%s1758_s5 + $0x40] sm:$0xff]  ;;  %v911_v8 = vld [vmem:[%s1758_s5 + $0xb8] sm:$0xff] }
 0x145   :  { %832 = vmatpush2.msra.mxu1 %v532_v12  ;;  %762 = vmatprep.subr.mxu0 %v401_v13  ;;  %v895_v11 = vld [vmem:[%s1758_s5 + $0x38] sm:$0xff]  ;;  %v910_v12 = vld [vmem:[%s1758_s5 + $0xb0] sm:$0xff] }
 0x146   :  { %833 = vmatprep.subr.mxu1 %v529_v14  ;;  %763 = vmatpush2.msra.mxu0 %v400_v15  ;;  %v894_v13 = vld [vmem:[%s1758_s5 + $0x30] sm:$0xff]  ;;  %v909_v14 = vld [vmem:[%s1758_s5 + $0xa8] sm:$0xff] }
 0x147   :  { %834 = vmatpush2.msra.mxu1 %v528_v16  ;;  %764 = vmatprep.subr.mxu0 %v397_v17  ;;  %v893_v15 = vld [vmem:[%s1758_s5 + $0x28] sm:$0xff]  ;;  %v908_v16 = vld [vmem:[%s1758_s5 + $0xa0] sm:$0xff] }
 0x148   :  { %835 = vmatprep.subr.mxu1 %v525_v18  ;;  %765 = vmatpush2.msra.mxu0 %v396_v19  ;;  %v892_v17 = vld [vmem:[%s1758_s5 + $0x20] sm:$0xff]  ;;  %v907_v18 = vld [vmem:[%s1758_s5 + $0x98] sm:$0xff] }
 0x149   :  { %836 = vmatpush2.msra.mxu1 %v524_v20  ;;  %766 = vmatprep.subr.mxu0 %v393_v21  ;;  %v891_v19 = vld [vmem:[%s1758_s5 + $0x18] sm:$0xff]  ;;  %v906_v20 = vld [vmem:[%s1758_s5 + $0x90] sm:$0xff] }
 0x14a   :  { %837 = vmatprep.subr.mxu1 %v521_v22  ;;  %767 = vmatpush2.msra.mxu0 %v392_v23  ;;  %v890_v21 = vld [vmem:[%s1758_s5 + $0x10] sm:$0xff]  ;;  %v905_v22 = vld [vmem:[%s1758_s5 + $0x88] sm:$0xff] }
 0x14b   :  { %838 = vmatpush2.msra.mxu1 %v520_v24  ;;  %768 = vmatprep.subr.mxu0 %v389_v25  ;;  %v889_v23 = vld [vmem:[%s1758_s5 + $0x8] sm:$0xff]  ;;  %v904_v24 = vld [vmem:[%s1758_s5 + $0x80] sm:$0xff] }
 0x14c   :  { %839 = vmatprep.subr.mxu1 %v517_v26  ;;  %769 = vmatpush2.msra.mxu0 %v388_v27  ;;  %v888_v25 = vld [vmem:[%s1758_s5] sm:$0xff]  ;;  %v951_v26 = vld [vmem:[%s1758_s5 + $0x1f8] sm:$0xff] }
 0x14d   :  { %840 = vmatpush2.msra.mxu1 %v516_v28  ;;  %770 = vmatprep.subr.mxu0 %v385_v29  ;;  %v935_v27 = vld [vmem:[%s1758_s5 + $0x178] sm:$0xff]  ;;  %v950_v28 = vld [vmem:[%s1758_s5 + $0x1f0] sm:$0xff] }
 0x14e   :  { %841 = vmatprep.subr.mxu1 %v513_v30  ;;  %771 = vmatpush2.msra.mxu0 %v384_v31  ;;  %v934_v29 = vld [vmem:[%s1758_s5 + $0x170] sm:$0xff]  ;;  %v949_v30 = vld [vmem:[%s1758_s5 + $0x1e8] sm:$0xff] }
 0x14f   :  { %842 = vmatpush2.msra.mxu1 %v512_v32  ;;  %772 = vmatprep.subr.mxu0 %v381_v33  ;;  %v933_v31 = vld [vmem:[%s1758_s5 + $0x168] sm:$0xff]  ;;  %v948_v32 = vld [vmem:[%s1758_s5 + $0x1e0] sm:$0xff] }
 0x150   :  { %843 = vmatprep.subr.mxu1 %v509_v34  ;;  %773 = vmatpush2.msra.mxu0 %v380_v35  ;;  %v932_v33 = vld [vmem:[%s1758_s5 + $0x160] sm:$0xff]  ;;  %v947_v34 = vld [vmem:[%s1758_s5 + $0x1d8] sm:$0xff] }
 0x151   :  { %844 = vmatpush2.msra.mxu1 %v508_v36  ;;  %774 = vmatprep.subr.mxu0 %v377_v37  ;;  %v931_v35 = vld [vmem:[%s1758_s5 + $0x158] sm:$0xff]  ;;  %v946_v36 = vld [vmem:[%s1758_s5 + $0x1d0] sm:$0xff] }
 0x152   :  { %845 = vmatprep.subr.mxu1 %v505_v38  ;;  %775 = vmatpush2.msra.mxu0 %v376_v39  ;;  %v930_v37 = vld [vmem:[%s1758_s5 + $0x150] sm:$0xff]  ;;  %v945_v38 = vld [vmem:[%s1758_s5 + $0x1c8] sm:$0xff] }
 0x153   :  { %846 = vmatpush2.msra.mxu1 %v504_v41  ;;  %776 = vmatprep.subr.mxu0 %v373_v42  ;;  %v929_v39 = vld [vmem:[%s1758_s5 + $0x148] sm:$0xff]  ;;  %v944_v41 = vld [vmem:[%s1758_s5 + $0x1c0] sm:$0xff] }
 0x154   :  { %847 = vmatprep.subr.mxu1 %v501_v44  ;;  %777 = vmatpush2.msra.mxu0 %v372_v45  ;;  %v928_v42 = vld [vmem:[%s1758_s5 + $0x140] sm:$0xff]  ;;  %v943_v44 = vld [vmem:[%s1758_s5 + $0x1b8] sm:$0xff] }
 0x155   :  { %848 = vmatpush2.msra.mxu1 %v500_v46  ;;  %778 = vmatprep.subr.mxu0 %v369_v47  ;;  %v927_v45 = vld [vmem:[%s1758_s5 + $0x138] sm:$0xff]  ;;  %v942_v46 = vld [vmem:[%s1758_s5 + $0x1b0] sm:$0xff] }
 0x156   :  { %849 = vmatprep.subr.mxu1 %v497_v48  ;;  %779 = vmatpush2.msra.mxu0 %v368_v49  ;;  %v926_v47 = vld [vmem:[%s1758_s5 + $0x130] sm:$0xff]  ;;  %v941_v48 = vld [vmem:[%s1758_s5 + $0x1a8] sm:$0xff] }
 0x157   :  { %850 = vmatpush2.msra.mxu1 %v496_v50  ;;  %780 = vmatprep.subr.mxu0 %v365_v51  ;;  %v925_v49 = vld [vmem:[%s1758_s5 + $0x128] sm:$0xff]  ;;  %v940_v50 = vld [vmem:[%s1758_s5 + $0x1a0] sm:$0xff] }
 0x158   :  { %851 = vmatprep.subr.mxu1 %v493_v52  ;;  %781 = vmatpush2.msra.mxu0 %v364_v53  ;;  %v924_v51 = vld [vmem:[%s1758_s5 + $0x120] sm:$0xff]  ;;  %v939_v52 = vld [vmem:[%s1758_s5 + $0x198] sm:$0xff] }
 0x159   :  { %852 = vmatpush2.msra.mxu1 %v492_v54  ;;  %783 = vmatmul.mubr.f32.vlgmr.msra.gmra.mxu0 %v1536_v40  ;;  %v902_v40 = vld [vmem:[%s1758_s5 + $0x70] sm:$0xff]  ;;  %v923_v53 = vld [vmem:[%s1758_s5 + $0x118] sm:$0xff] }
 0x15a   :  { %854 = vmatmul.mubr.f32.vlgmr.msra.gmra.mxu1 %v1538_v43  ;;  %1125 = vmatprep.subr.mxu0 %v919_v55  ;;  %v917_v43 = vld [vmem:[%s1758_s5 + $0xe8] sm:$0xff]  ;;  %v938_v54 = vld [vmem:[%s1758_s5 + $0x190] sm:$0xff] }
 0x15b   :  { %1126 = vmatpush3.msra.mxu0 %v903_v56  ;;  %1160 = vmatprep.subr.mxu1 %v951_v26  ;;  %v922_v55 = vld [vmem:[%s1758_s5 + $0x110] sm:$0xff]  ;;  %v937_v56 = vld [vmem:[%s1758_s5 + $0x188] sm:$0xff] }
 0x15c   :  { %1127 = vmatprep.subr.mxu0 %v918_v57  ;;  %1161 = vmatpush3.msra.mxu1 %v935_v27  ;;  %v921_v57 = vld [vmem:[%s1758_s5 + $0x108] sm:$0xff] }
 0x15d   :  { %1128 = vmatpush3.msra.mxu0 %v902_v40  ;;  %1162 = vmatprep.subr.mxu1 %v950_v28  ;;  %v936_v40 = vld [vmem:[%s1758_s5 + $0x180] sm:$0xff] }
 0x15e   :  { %1129 = vmatprep.subr.mxu0 %v917_v43  ;;  %1163 = vmatpush3.msra.mxu1 %v934_v29  ;;  %v920_v43 = vld [vmem:[%s1758_s5 + $0x100] sm:$0xff] }
 0x15f   :  { %1130 = vmatpush3.msra.mxu0 %v901_v58  ;;  %1164 = vmatprep.subr.mxu1 %v949_v30  ;;  %v554_v58 = vld [vmem:[%s1757_s4] sm:$0xf] }
 0x160   :  { %1131 = vmatprep.subr.mxu0 %v916_v59  ;;  %1165 = vmatpush3.msra.mxu1 %v933_v31  ;;  %v559_v59 = vrot.slane %v554_v58, %v110_v6 }
 0x161   :  { %1132 = vmatpush3.msra.mxu0 %v900_v60  ;;  %1166 = vmatprep.subr.mxu1 %v948_v32  ;;  %v563_v60 = vrot.slane %v554_v58, %v114_v9 }
 0x162   :  { %1133 = vmatprep.subr.mxu0 %v915_v61  ;;  %1167 = vmatpush3.msra.mxu1 %v932_v33 }
 0x163   :  { %1134 = vmatpush3.msra.mxu0 %v899_v62  ;;  %1168 = vmatprep.subr.mxu1 %v947_v34 }
 0x164   :  { %1135 = vmatprep.subr.mxu0 %v914_v63  ;;  %1169 = vmatpush3.msra.mxu1 %v931_v35 }
 0x165   :  { %1136 = vmatpush3.msra.mxu0 %v898_v0  ;;  %1170 = vmatprep.subr.mxu1 %v946_v36 }
 0x166   :  { %1137 = vmatprep.subr.mxu0 %v913_v1  ;;  %1171 = vmatpush3.msra.mxu1 %v930_v37 }
 0x167   :  { %1138 = vmatpush3.msra.mxu0 %v897_v2  ;;  %1172 = vmatprep.subr.mxu1 %v945_v38  ;;  %v1124_v38 = vld [vmem:[%s1759_s6] ss:$0 sm:$0xff] }
 0x168   :  { %1139 = vmatprep.subr.mxu0 %v912_v3  ;;  %1173 = vmatpush3.msra.mxu1 %v929_v39 }
 0x169   :  { %1140 = vmatpush3.msra.mxu0 %v896_v4  ;;  %1174 = vmatprep.subr.mxu1 %v944_v41 }
 0x16a   :  { %1141 = vmatprep.subr.mxu0 %v911_v8  ;;  %1175 = vmatpush3.msra.mxu1 %v928_v42 }
 0x16b   :  { %1142 = vmatpush3.msra.mxu0 %v895_v11  ;;  %1176 = vmatprep.subr.mxu1 %v943_v44 }
 0x16c   :  { %1143 = vmatprep.subr.mxu0 %v910_v12  ;;  %1177 = vmatpush3.msra.mxu1 %v927_v45 }
 0x16d   :  { %1144 = vmatpush3.msra.mxu0 %v894_v13  ;;  %1178 = vmatprep.subr.mxu1 %v942_v46 }
 0x16e   :  { %1145 = vmatprep.subr.mxu0 %v909_v14  ;;  %1179 = vmatpush3.msra.mxu1 %v926_v47 }
 0x16f   :  { %1146 = vmatpush3.msra.mxu0 %v893_v15  ;;  %1180 = vmatprep.subr.mxu1 %v941_v48 }
 0x170   :  { %1147 = vmatprep.subr.mxu0 %v908_v16  ;;  %1181 = vmatpush3.msra.mxu1 %v925_v49 }
 0x171   :  { %1148 = vmatpush3.msra.mxu0 %v892_v17  ;;  %1182 = vmatprep.subr.mxu1 %v940_v50 }
 0x172   :  { %1149 = vmatprep.subr.mxu0 %v907_v18  ;;  %1183 = vmatpush3.msra.mxu1 %v924_v51  ;;  %v567_v18 = vrot.slane %v554_v58, %v118_v7 }
 0x173   :  { %1150 = vmatpush3.msra.mxu0 %v891_v19  ;;  %1184 = vmatprep.subr.mxu1 %v939_v52  ;;  %v571_v19 = vrot.slane %v554_v58, %v122_v10 }
 0x174   :  { %1151 = vmatprep.subr.mxu0 %v906_v20  ;;  %1185 = vmatpush3.msra.mxu1 %v923_v53 }
 0x175   :  { %1152 = vmatpush3.msra.mxu0 %v890_v21  ;;  %1186 = vmatprep.subr.mxu1 %v938_v54 }
 0x176   :  { %1153 = vmatprep.subr.mxu0 %v905_v22  ;;  %1187 = vmatpush3.msra.mxu1 %v922_v55 }
 0x177   :  { %1154 = vmatpush3.msra.mxu0 %v889_v23  ;;  %1188 = vmatprep.subr.mxu1 %v937_v56 }
 0x178   :  { %1155 = vmatprep.subr.mxu0 %v904_v24  ;;  %1189 = vmatpush3.msra.mxu1 %v921_v57 }
 0x179   :  { %1156 = vmatpush3.msra.mxu0 %v888_v25  ;;  %1190 = vmatprep.subr.mxu1 %v936_v40 }
 0x17a   :  { %1191 = vmatpush3.msra.mxu1 %v920_v43 }
 0x1d8   :  { %v642_v61 = vpop.f32.mrf.mxu0 }
 0x1d9   :  { %v643_v62 = vadd.f32 %v642_v61, %v559_v59  ;;  %v713_v63 = vpop.f32.mrf.mxu1 }
 0x1da   :  { %v644_v0 = vpop.f32.mrf.mxu0 }
 0x1db   :  { %v714_v1 = vadd.f32 %v713_v63, %v643_v62  ;;  %v645_v2 = vadd.f32 %v644_v0, %v563_v60  ;;  %v715_v3 = vpop.f32.mrf.mxu1 }
 0x1dd   :  { %v1120_v4 = vmul.f32 -1.442695, %v714_v1  ;;  %v716_v8 = vadd.f32 %v715_v3, %v645_v2 }
 0x1df   :  { %1216 = vpow2.f32 %v1120_v4  ;;  %v1121_v11 = vmul.f32 -1.442695, %v716_v8 }
 0x1e1   :  { %1218 = vpow2.f32 %v1121_v11 }
 0x1ec   :  { %v1217_v12 = vpop.eup %1216 }
 0x1ed   :  { %v872_v13 = vadd.f32 1.0, %v1217_v12 }
 0x1ee   :  { %v1219_v14 = vpop.eup %1218 }
 0x1ef   :  { %v873_v15 = vadd.f32 1.0, %v1219_v14  ;;  %1220 = vrcp.f32 %v872_v13 }
 0x1f1   :  { %1222 = vrcp.f32 %v873_v15 }
 0x1fc   :  { %v1221_v6 = vpop.eup %1220 }
 0x1fd   :  { %v884_v17 = vmul.f32 %v1221_v6, %v714_v1 }
 0x1fe   :  { %v1223_v9 = vpop.eup %1222 }
 0x1ff   :  { %v885_v16 = vmul.f32 %v1223_v9, %v716_v8 }
 0x201   :  { %1023 = vmatprep.mubr.f32.mxu0 %v885_v16 }
 0x202   :  { %1024 = vmatmul.mubr.f32.vlgmr.msra.gmra.mxu0 %v884_v17 }
 0x219   :  { %v784_v20 = vpop.f32.mrf.mxu0 }
 0x21a   :  { %v785_v21 = vadd.f32 %v784_v20, %v567_v18  ;;  %v855_v22 = vpop.f32.mrf.mxu1 }
 0x21b   :  { %v786_v23 = vpop.f32.mrf.mxu0 }
 0x21c   :  { %v856_v24 = vadd.f32 %v855_v22, %v785_v21  ;;  %v787_v25 = vadd.f32 %v786_v23, %v571_v19  ;;  %v857_v26 = vpop.f32.mrf.mxu1 }
 0x21e   :  { %v1122_v27 = vmul.f32 -1.442695, %v856_v24  ;;  %v858_v28 = vadd.f32 %v857_v26, %v787_v25 }
 0x220   :  { %1224 = vpow2.f32 %v1122_v27  ;;  %v1123_v29 = vmul.f32 -1.442695, %v858_v28 }
 0x222   :  { %1226 = vpow2.f32 %v1123_v29 }
 0x22d   :  { %v1225_v30 = vpop.eup %1224 }
 0x22e   :  { %v874_v31 = vadd.f32 1.0, %v1225_v30 }
 0x22f   :  { %v1227_v32 = vpop.eup %1226 }
 0x230   :  { %v875_v33 = vadd.f32 1.0, %v1227_v32  ;;  %1228 = vrcp.f32 %v874_v31 }
 0x232   :  { %1230 = vrcp.f32 %v875_v33 }
 0x23d   :  { %v1229_v5 = vpop.eup %1228 }
 0x23e   :  { %v886_v34 = vmul.f32 %v1229_v5, %v856_v24 }
 0x23f   :  { %v1231_v7 = vpop.eup %1230 }
 0x240   :  { %v887_v10 = vmul.f32 %v1231_v7, %v858_v28 }
 0x242   :  { %1093 = vmatprep.mubr.f32.mxu1 %v887_v10 }
 0x243   :  { %1094 = vmatmul.mubr.f32.vlgmr.msra.gmra.mxu1 %v886_v34 }
 0x2c2   :  { %v1157_v35 = vpop.f32.mrf.mxu0 }
 0x2c4   :  { %v1158_v36 = vpop.f32.mrf.mxu0 }
 0x2c5   :  { %v1159_v37 = vadd.f32 %v1158_v36, %v1157_v35 }
 0x2c7   :  { %v1026_v42 = vadd.f32 %v1159_v37, %v1124_v38 }
 0x303   :  { %v1192_v39 = vpop.f32.mrf.mxu1 }
 0x305   :  { %v1193_v41 = vpop.f32.mrf.mxu1 }
 0x306   :  { %v1194_v44 = vadd.f32 %v1193_v41, %v1192_v39 }
 0x308   :  { %v1096_v45 = vadd.f32 %v1194_v44, %v1026_v42 }
 0x30a   :  { %1100 = vst.msk [vmem:[#allocation5] sm:$0x3] %vm1099_vm0, %v1096_v45 }
 0x30b   :  { %1263 = shalt.err (!%p1260_p9)
}
 0x30c   :  { %1110 = dma.vmem_to_hbm [thread:$0]  %s1108_s15, 32, %s1760_s7, [#allocation4]  }
 0x30d   :  { %1274 = dma.done.wait [#allocation4], 32  }
 0x30e   :  { %1275 = vsyncadd [#allocation4], 4294967264 }
 0x30f   :  { %1114 = vsyncpa [#allocation3], 1 }
 0x310   :  { %1115 = vsyncpa [#allocation4], 1 }

</bundles_post_ra>
